<compile_context>
chip_gen: v7x
topology: tpu7x:2x2x1
jax: 0.10.0
libtpu: 0.0.40
codegen_flags: <defaults>
</compile_context>

<pallas_src>
import functools
import math

import numpy as np
import jax
import jax.numpy as jnp
from jax.experimental import pallas as pl
from jax.experimental.pallas import tpu as pltpu


def _round_up(a, b):
    return (a + b - 1) // b * b


# ----------------------------- Pallas kernel ------------------------------ #
def _moe_dense_kernel(x_ref, cw_ref, w_ref, b_ref, o_ref):
    """Dense top-1 MoE tile: o = sum_e cw[:, e] * (x @ W_e + b_e).

    x_ref : (TM, K)     bf16  token tile (one graph level)
    cw_ref: (TM, E)     f32   combine weights (top-1 prob; 0 for dropped tokens)
    w_ref : (E, K, TN)  bf16  expert weights, (in, out) layout
    b_ref : (E, 1, TN)  f32   expert biases
    o_ref : (TM, TN)    f32
    """
    x = x_ref[...]
    cw = cw_ref[...]
    acc = jnp.zeros(o_ref.shape, jnp.float32)
    for e in range(w_ref.shape[0]):                      # static unroll, E == 3
        y = jnp.dot(x, w_ref[e], preferred_element_type=jnp.float32)  # MXU, f32 acc
        y = y + b_ref[e]                                 # (1, TN) broadcast
        acc = acc + cw[:, e:e + 1] * y                   # 0 for padded/dropped rows
    o_ref[...] = acc.astype(o_ref.dtype)


def moe_dense_pallas(x, cw, w, b, *, tm=256, tn=256):
    """Batched (over levels) dense top-1 MoE projection.

    x : [L, N, K]     bf16  tokens per level (K padded to a 128 multiple)
    cw: [L, N, E]     f32   combine weights
    w : [L, E, K, H]  bf16  expert weights
    b : [L, E, 1, H]  f32   expert biases
    returns [L, N, H] f32
    """
    L, N, K = x.shape
    _, E, _, H = w.shape

    # Row tile: fill the 128/256-row MXU; never below the 8-sublane quantum.
    tm = min(tm, _round_up(N, 8))
    n_pad = _round_up(N, tm)
    # Hidden tile: lane-dense multiple of 128 so stores are unmasked `vst`.
    tn = min(tn, H)
    if H % tn != 0:
        tn = 128 if H % 128 == 0 else H

    if n_pad != N:  # padded rows carry cw == 0 -> exact zeros, stripped below
        x = jnp.pad(x, ((0, 0), (0, n_pad - N), (0, 0)))
        cw = jnp.pad(cw, ((0, 0), (0, n_pad - N), (0, 0)))

    grid = (L, n_pad // tm, H // tn)
    flops = 2 * L * n_pad * K * H * E
    bytes_accessed = (x.size * x.dtype.itemsize + cw.size * cw.dtype.itemsize
                      + w.size * w.dtype.itemsize + b.size * b.dtype.itemsize
                      + L * n_pad * H * 4)

    out = pl.pallas_call(
        _moe_dense_kernel,
        out_shape=jax.ShapeDtypeStruct((L, n_pad, H), jnp.float32),
        grid=grid,
        in_specs=[
            pl.BlockSpec((None, tm, K), lambda l, i, j: (l, i, 0)),        # tokens
            pl.BlockSpec((None, tm, E), lambda l, i, j: (l, i, 0)),        # combine w
            pl.BlockSpec((None, E, K, tn), lambda l, i, j: (l, 0, 0, j)),  # experts
            pl.BlockSpec((None, E, 1, tn), lambda l, i, j: (l, 0, 0, j)),  # biases
        ],
        out_specs=pl.BlockSpec((None, tm, tn), lambda l, i, j: (l, i, j)),
        compiler_params=pltpu.CompilerParams(
            dimension_semantics=("parallel", "parallel", "parallel"),
            vmem_limit_bytes=48 * 1024 * 1024),
        cost_estimate=pl.CostEstimate(flops=flops, transcendentals=0,
                                      bytes_accessed=bytes_accessed),
    )(x, cw, w, b)
    return out[:, :N]


# ------------------------------ top-1 gating ------------------------------- #
def _top1_combine_weights(logits, capacity):
    """DeepSpeed `top1gating` combine weights (eval / deterministic drop order).

    logits: [..., N, E] f32.  Returns [..., N, E]: the top-1 softmax prob in the
    selected expert's column for kept tokens, 0 elsewhere / for dropped tokens.
    """
    gates = jax.nn.softmax(logits, axis=-1)
    mask1 = jax.nn.one_hot(jnp.argmax(gates, axis=-1), logits.shape[-1],
                           dtype=jnp.float32)
    # arrival-order slot of each token inside its expert's capacity buffer
    locations = jnp.cumsum(mask1, axis=-2) - 1.0
    keep = mask1 * (locations < capacity).astype(jnp.float32)
    # TODO(synk): DeepSpeed's training-time random-token-selection (use_rts)
    # drop order and the auxiliary l_aux / exp_counts outputs are not
    # reproduced; the PyTorch forward only consumes output[0].
    return gates * keep


# ------------------------------- forward ----------------------------------- #
def _type2_moe_forward(features, gate_w, exp_w, exp_b, *, capacity_factor,
                       use_pallas=True):
    """features: [B, 3, S, H] -> [B, 3, S, H]."""
    B, L, S, H = features.shape
    E = gate_w.shape[-1]
    Hp = exp_w.shape[-1]
    N = B * S

    # levels-first token matrix, mirroring permute(1, 0, 2, 3) + reshape(-1, H)
    x = jnp.transpose(features, (1, 0, 2, 3)).reshape(L, N, H)

    # --- top-1 gating (tiny [N, 3] bookkeeping; stays in jitted XLA) -------- #
    # TODO(synk): the capacity dispatch is data-dependent (variable tokens per
    # expert), so there is no static-shape Pallas gather for it; with 3 experts
    # the dense per-expert matmul in the kernel is the cheaper formulation.
    logits = jnp.einsum('lnk,lke->lne', x.astype(jnp.float32), gate_w)
    capacity = int(math.ceil((N / E) * capacity_factor))   # min_capacity == 0
    cw = _top1_combine_weights(logits, capacity)            # [L, N, E] f32

    # --- expert compute (hot path) ----------------------------------------- #
    xk = x.astype(jnp.bfloat16)                              # MXU-native operands
    if Hp != H:                                              # lane-dense padding
        xk = jnp.pad(xk, ((0, 0), (0, 0), (0, Hp - H)))
    if use_pallas:
        out = moe_dense_pallas(xk, cw, exp_w, exp_b)         # [L, N, Hp]
    else:  # pure-XLA reference with identical numerics (bf16 in, f32 acc)
        y = jnp.einsum('lnk,lekh->lenh', xk, exp_w,
                       preferred_element_type=jnp.float32) + exp_b
        out = jnp.einsum('lne,lenh->lnh', cw, y)
    out = out[:, :, :H]
    return jnp.transpose(out.reshape(L, B, S, H), (1, 0, 2, 3))


class Type2MoE:
    """JAX/Pallas port of `type2_moe`: one top-1 MoE (3 Linear(H, H) experts)
    per graph level (graph / motif / node)."""

    NUM_LEVELS = 3
    NUM_EXPERTS = 3

    def __init__(self, hidden_size=300, eval_capacity_factor=2.0, key=None):
        key = jax.random.PRNGKey(0) if key is None else key
        L, E, H = self.NUM_LEVELS, self.NUM_EXPERTS, hidden_size
        Hp = _round_up(H, 128)           # lane-dense hidden (padding done once)
        kg, kw, kb = jax.random.split(key, 3)
        bound = 1.0 / np.sqrt(H)

        # TopKGate: Linear(H, E, bias=False), evaluated in f32.
        self.gate_w = jax.random.uniform(kg, (L, H, E), jnp.float32, -bound, bound)
        # Experts: Linear(H, H) stored transposed (in, out); bf16-cast + padded
        # once at init.  (The PyTorch module deepcopies one Linear into every
        # expert; weights are not transferred here, so experts are init'd iid.)
        w = jax.random.uniform(kw, (L, E, H, H), jnp.float32, -bound, bound)
        self.expert_w = jnp.pad(
            w, ((0, 0), (0, 0), (0, Hp - H), (0, Hp - H))).astype(jnp.bfloat16)
        b = jax.random.uniform(kb, (L, E, H), jnp.float32, -bound, bound)
        self.expert_b = jnp.pad(b, ((0, 0), (0, 0), (0, Hp - H))).reshape(L, E, 1, Hp)

        self.hidden_size = H
        self.eval_capacity_factor = eval_capacity_factor   # module in eval mode
        self._forward = jax.jit(functools.partial(
            _type2_moe_forward, capacity_factor=eval_capacity_factor))

    def __call__(self, features):
        return self._forward(features, self.gate_w, self.expert_w, self.expert_b)


# --------------------------------- demo ------------------------------------ #
if __name__ == "__main__":
    B, L, S, H = 2, 3, 256, 256            # small, lane-dense demo shapes
    key = jax.random.PRNGKey(0)
    kf, kp = jax.random.split(key)
    features = jax.random.normal(kf, (B, L, S, H), jnp.float32)

    mod = Type2MoE(hidden_size=H, key=kp)
    out = jax.block_until_ready(mod(features))
    assert out.shape == (B, L, S, H), out.shape

    # Pure-XLA reference with identical gating and bf16/f32 numerics.
    ref_fn = jax.jit(functools.partial(
        _type2_moe_forward, capacity_factor=mod.eval_capacity_factor,
        use_pallas=False))
    ref = jax.block_until_ready(
        ref_fn(features, mod.gate_w, mod.expert_w, mod.expert_b))
    np.testing.assert_allclose(np.asarray(out), np.asarray(ref),
                               rtol=2e-3, atol=2e-3)

    print("KERNEL_OK")
</pallas_src>

<mosaic_0001>
module attributes {stable_mosaic.version = 11 : i64} {
  func.func @_moe_dense_kernel(%arg0: i32, %arg1: i32, %arg2: i32, %arg3: memref<1x256x256xbf16, #tpu.memory_space<vmem>>, %arg4: memref<1x256x3xf32, #tpu.memory_space<vmem>>, %arg5: memref<1x3x256x256xbf16, #tpu.memory_space<vmem>>, %arg6: memref<1x3x1x256xf32, #tpu.memory_space<vmem>>, %arg7: memref<1x256x256xf32, #tpu.memory_space<vmem>>) attributes {dimension_semantics = [#tpu.dimension_semantics<parallel>, #tpu.dimension_semantics<parallel>, #tpu.dimension_semantics<parallel>], iteration_bounds = array<i64: 3, 2, 1>, scalar_prefetch = 0 : i64, scratch_operands = 0 : i64, tpu.core_type = #tpu.core_type<tc>, window_params = [{transform_indices = @transform_0, window_bounds = array<i64: 1, 256, 256>}, {transform_indices = @transform_1, window_bounds = array<i64: 1, 256, 3>}, {transform_indices = @transform_2, window_bounds = array<i64: 1, 3, 256, 256>}, {transform_indices = @transform_3, window_bounds = array<i64: 1, 3, 1, 256>}, {transform_indices = @transform_4, window_bounds = array<i64: 1, 256, 256>}]} {
    %c0 = arith.constant 0 : index
    %c0_0 = arith.constant 0 : index
    %c0_1 = arith.constant 0 : index
    %0 = vector.load %arg3[%c0, %c0_0, %c0_1] : memref<1x256x256xbf16, #tpu.memory_space<vmem>>, vector<1x256x256xbf16>
    %1 = vector.shape_cast %0 : vector<1x256x256xbf16> to vector<256x256xbf16>
    %c0_2 = arith.constant 0 : index
    %c0_3 = arith.constant 0 : index
    %c0_4 = arith.constant 0 : index
    %2 = vector.load %arg4[%c0_2, %c0_3, %c0_4] : memref<1x256x3xf32, #tpu.memory_space<vmem>>, vector<1x256x3xf32>
    %3 = vector.shape_cast %2 : vector<1x256x3xf32> to vector<256x3xf32>
    %cst = arith.constant 0.000000e+00 : f32
    %4 = vector.broadcast %cst : f32 to vector<256x256xf32>
    %c0_5 = arith.constant 0 : index
    %c0_6 = arith.constant 0 : index
    %c0_7 = arith.constant 0 : index
    %c0_8 = arith.constant 0 : index
    %5 = vector.load %arg5[%c0_5, %c0_6, %c0_7, %c0_8] : memref<1x3x256x256xbf16, #tpu.memory_space<vmem>>, vector<1x1x256x256xbf16>
    %6 = vector.shape_cast %5 : vector<1x1x256x256xbf16> to vector<256x256xbf16>
    %cst_9 = arith.constant dense<0.000000e+00> : vector<256x256xf32>
    %7 = tpu.matmul %1, %6, %cst_9 {dimension_numbers = #tpu.dot_dimension_numbers<[1], [0], [0], [1], [0, 0, 1, 1], [], []>} : vector<256x256xbf16>, vector<256x256xbf16>, vector<256x256xf32> -> vector<256x256xf32>
    %c0_10 = arith.constant 0 : index
    %c0_11 = arith.constant 0 : index
    %c0_12 = arith.constant 0 : index
    %c0_13 = arith.constant 0 : index
    %8 = vector.load %arg6[%c0_10, %c0_11, %c0_12, %c0_13] : memref<1x3x1x256xf32, #tpu.memory_space<vmem>>, vector<1x1x1x256xf32>
    %9 = vector.shape_cast %8 : vector<1x1x1x256xf32> to vector<1x256xf32>
    %10 = vector.broadcast %9 : vector<1x256xf32> to vector<256x256xf32>
    %11 = arith.addf %7, %10 : vector<256x256xf32>
    %12 = vector.extract_strided_slice %3 {offsets = [0, 0], sizes = [256, 1], strides = [1, 1]} : vector<256x3xf32> to vector<256x1xf32>
    %13 = vector.broadcast %12 : vector<256x1xf32> to vector<256x256xf32>
    %14 = arith.mulf %13, %11 : vector<256x256xf32>
    %15 = arith.addf %4, %14 : vector<256x256xf32>
    %c0_14 = arith.constant 0 : index
    %c1 = arith.constant 1 : index
    %c0_15 = arith.constant 0 : index
    %c0_16 = arith.constant 0 : index
    %16 = vector.load %arg5[%c0_14, %c1, %c0_15, %c0_16] : memref<1x3x256x256xbf16, #tpu.memory_space<vmem>>, vector<1x1x256x256xbf16>
    %17 = vector.shape_cast %16 : vector<1x1x256x256xbf16> to vector<256x256xbf16>
    %cst_17 = arith.constant dense<0.000000e+00> : vector<256x256xf32>
    %18 = tpu.matmul %1, %17, %cst_17 {dimension_numbers = #tpu.dot_dimension_numbers<[1], [0], [0], [1], [0, 0, 1, 1], [], []>} : vector<256x256xbf16>, vector<256x256xbf16>, vector<256x256xf32> -> vector<256x256xf32>
    %c0_18 = arith.constant 0 : index
    %c1_19 = arith.constant 1 : index
    %c0_20 = arith.constant 0 : index
    %c0_21 = arith.constant 0 : index
    %19 = vector.load %arg6[%c0_18, %c1_19, %c0_20, %c0_21] : memref<1x3x1x256xf32, #tpu.memory_space<vmem>>, vector<1x1x1x256xf32>
    %20 = vector.shape_cast %19 : vector<1x1x1x256xf32> to vector<1x256xf32>
    %21 = vector.broadcast %20 : vector<1x256xf32> to vector<256x256xf32>
    %22 = arith.addf %18, %21 : vector<256x256xf32>
    %23 = vector.extract_strided_slice %3 {offsets = [0, 1], sizes = [256, 1], strides = [1, 1]} : vector<256x3xf32> to vector<256x1xf32>
    %24 = vector.broadcast %23 : vector<256x1xf32> to vector<256x256xf32>
    %25 = arith.mulf %24, %22 : vector<256x256xf32>
    %26 = arith.addf %15, %25 : vector<256x256xf32>
    %c0_22 = arith.constant 0 : index
    %c2 = arith.constant 2 : index
    %c0_23 = arith.constant 0 : index
    %c0_24 = arith.constant 0 : index
    %27 = vector.load %arg5[%c0_22, %c2, %c0_23, %c0_24] : memref<1x3x256x256xbf16, #tpu.memory_space<vmem>>, vector<1x1x256x256xbf16>
    %28 = vector.shape_cast %27 : vector<1x1x256x256xbf16> to vector<256x256xbf16>
    %cst_25 = arith.constant dense<0.000000e+00> : vector<256x256xf32>
    %29 = tpu.matmul %1, %28, %cst_25 {dimension_numbers = #tpu.dot_dimension_numbers<[1], [0], [0], [1], [0, 0, 1, 1], [], []>} : vector<256x256xbf16>, vector<256x256xbf16>, vector<256x256xf32> -> vector<256x256xf32>
    %c0_26 = arith.constant 0 : index
    %c2_27 = arith.constant 2 : index
    %c0_28 = arith.constant 0 : index
    %c0_29 = arith.constant 0 : index
    %30 = vector.load %arg6[%c0_26, %c2_27, %c0_28, %c0_29] : memref<1x3x1x256xf32, #tpu.memory_space<vmem>>, vector<1x1x1x256xf32>
    %31 = vector.shape_cast %30 : vector<1x1x1x256xf32> to vector<1x256xf32>
    %32 = vector.broadcast %31 : vector<1x256xf32> to vector<256x256xf32>
    %33 = arith.addf %29, %32 : vector<256x256xf32>
    %34 = vector.extract_strided_slice %3 {offsets = [0, 2], sizes = [256, 1], strides = [1, 1]} : vector<256x3xf32> to vector<256x1xf32>
    %35 = vector.broadcast %34 : vector<256x1xf32> to vector<256x256xf32>
    %36 = arith.mulf %35, %33 : vector<256x256xf32>
    %37 = arith.addf %26, %36 : vector<256x256xf32>
    %c0_30 = arith.constant 0 : index
    %c0_31 = arith.constant 0 : index
    %c0_32 = arith.constant 0 : index
    %38 = vector.load %arg7[%c0_30, %c0_31, %c0_32] : memref<1x256x256xf32, #tpu.memory_space<vmem>>, vector<1x256x256xf32>
    %39 = vector.shape_cast %38 : vector<1x256x256xf32> to vector<256x256xf32>
    %40 = vector.shape_cast %37 : vector<256x256xf32> to vector<1x256x256xf32>
    tpu.vector_store %arg7[%c0_30, %c0_31, %c0_32], %40 {strides = array<i32>} : memref<1x256x256xf32, #tpu.memory_space<vmem>>, vector<1x256x256xf32>,
    return
  }
  func.func @transform_0(%arg0: i32, %arg1: i32, %arg2: i32) -> (i32, i32, i32) {
    %c0_i32 = arith.constant 0 : i32
    %c0_i32_0 = arith.constant 0 : i32
    return %arg0, %arg1, %c0_i32 : i32, i32, i32
  }
  func.func @transform_1(%arg0: i32, %arg1: i32, %arg2: i32) -> (i32, i32, i32) {
    %c0_i32 = arith.constant 0 : i32
    %c0_i32_0 = arith.constant 0 : i32
    return %arg0, %arg1, %c0_i32 : i32, i32, i32
  }
  func.func @transform_2(%arg0: i32, %arg1: i32, %arg2: i32) -> (i32, i32, i32, i32) {
    %c0_i32 = arith.constant 0 : i32
    %c0_i32_0 = arith.constant 0 : i32
    %c0_i32_1 = arith.constant 0 : i32
    return %arg0, %c0_i32, %c0_i32_0, %arg2 : i32, i32, i32, i32
  }
  func.func @transform_3(%arg0: i32, %arg1: i32, %arg2: i32) -> (i32, i32, i32, i32) {
    %c0_i32 = arith.constant 0 : i32
    %c0_i32_0 = arith.constant 0 : i32
    %c0_i32_1 = arith.constant 0 : i32
    return %arg0, %c0_i32, %c0_i32_0, %arg2 : i32, i32, i32, i32
  }
  func.func @transform_4(%arg0: i32, %arg1: i32, %arg2: i32) -> (i32, i32, i32) {
    %c0_i32 = arith.constant 0 : i32
    return %arg0, %arg1, %arg2 : i32, i32, i32
  }
}

</mosaic_0001>

<bundles_post_ra>
// kernel: _type2_moe_forward.1
= control target key start
LH: loop header
LB: loop body
LE: loop exit
PB: predicated region body
PF: predicated region fallthrough
CT: control target
= control target key end

     0   :  { %s3370_s15 = smov 0   ;;  %s3372_s16 = smov 0   ;;  %s4666_s0 = inlined_call_operand.vmem [shape: bf16[3,512,256], index: 0, kind: input, shape index: {}]   ;;  %s4667_s1 = inlined_call_operand.vmem [shape: f32[3,512,3], index: 1, kind: input, shape index: {}]   ;;  %s4668_s2 = inlined_call_operand.vmem [shape: bf16[3,3,256,256], index: 2, kind: input, shape index: {}]   ;;  %s4669_s3 = inlined_call_operand.vmem [shape: f32[3,3,1,256], index: 3, kind: input, shape index: {}]   ;;  %s4670_s4 = inlined_call_operand.vmem [shape: f32[3,512,256], index: 4, kind: output, shape index: {}]  }
   0x1   :  { %s3374_s17 = smov 0   ;;  %s3376_s18 = smov 0  }
   0x2   :  { %s3378_s19 = smov 0  }
   0x3 LB: > { %s29_s20 = sadd.s32 1, %s3332_s17  ;;  %s33_s21 = sadd.s32 1, %s3336_s18  ;;  %s3340_s19 = sphi %s3378_s19, %s14_s19   ;;  %s3336_s18 = sphi %s3376_s18, %s4863_s18   ;;  %s3332_s17 = sphi %s3374_s17, %s4862_s17   ;;  %s3328_s16 = sphi %s3372_s16, %s4861_s16   ;;  %s3324_s15 = sphi %s3370_s15, %s4860_s15  }
   0x4   : > { %p31_p0 = scmp.ge.s32.totalorder %s29_s20, 2  ;;  %p2818_p1 = scmp.ge.s32.totalorder %s3340_s19, 1 }
   0x5   : > { %p243_p2 = scmp.lt.s32.totalorder %s3340_s19, 7 }
   0x6   : > { %s4865_s20 = smov (%p31_p0, %s29_s20), 0  ;;  %s4867_s21 = smov (!%p31_p0, %s33_s21), %s3336_s18 }
   0x7   : > { %p244_p3 = pnand %p2818_p1, %p243_p2  ;;  %p35_p4 = scmp.ge.s32.totalorder %s4867_s21, 3 }
   0x9   : > { %s4869_s21 = smov (%p35_p4, %s4867_s21), 0  ;;  %247 = sbr.rel (%p244_p3) target bundleno = 495 (0x1ef), region = 36 }
  0x10   : > { %p310_p5 = scmp.lt.s32.totalorder %s3328_s16, 2  ;;  %v3342_v0 = vmov 0   ;;  %s2819_s26 = sshll.u32 %s3324_s15, 5 }
  0x11   : > { %3105 = vset.pattern.permute.xlu1 %v3342_v0  ;;  %3104 = vset.pattern.permute.xlu0 %v3342_v0  ;;  %p312_p6 = scmp.lt.s32.totalorder %s2819_s26, 63 }
  0x12   : > { %s4871_s16 = smov (!%p310_p5, %s3328_s16), 2 }
  0x13   : > { %s3059_s22 = smul.u32 768, %s4871_s16  ;;  %s4873_s26 = smov (!%p312_p6, %s2819_s26), 63 }
  0x14   : > { %s2820_s27 = sshll.u32 %s4873_s26, 1  ;;  %s2821_s28 = sshll.u32 %s4871_s16, 7 }
  0x15   : > { %s3408_s25 = scalar_lea.vmem %s4668_s2, %s3059_s22  ;;  %s3424_s29 = sadd.s32 %s2821_s28, %s2820_s27 }
  0x16   : > { %v3110_v1 = vld [vmem:[%s3408_s25 + $0x4] ss:$8 sps:$4 sm:$0xff]   ;;  %v3112_v2 = vld [vmem:[%s3408_s25] ss:$8 sps:$4 sm:$0xff]   ;;  %v3113_v3 = vld [vmem:[%s3408_s25 + $0x14] ss:$8 sps:$4 sm:$0xff]  }
  0x17   : > { %793 = vmatprep.subr.bf16.mxu0 %v3110_v1  ;;  %3027 = vmatprep.subr.bf16.mxu1 %v3110_v1  ;;  %v3115_v4 = vld [vmem:[%s3408_s25 + $0x10] ss:$8 sps:$4 sm:$0xff]   ;;  %v3116_v5 = vld [vmem:[%s3408_s25 + $0x24] ss:$8 sps:$4 sm:$0xff]   ;;  %v3118_v6 = vld [vmem:[%s3408_s25 + $0x20] ss:$8 sps:$4 sm:$0xff]  }
  0x18   : > { %794 = vmatpush1.bf16.msra.mxu0 %v3112_v2  ;;  %3043 = vmatpush1.bf16.msra.mxu1 %v3112_v2  ;;  %v3119_v7 = vld [vmem:[%s3408_s25 + $0x34] ss:$8 sps:$4 sm:$0xff]   ;;  %v3121_v8 = vld [vmem:[%s3408_s25 + $0x30] ss:$8 sps:$4 sm:$0xff]   ;;  %v3122_v9 = vld [vmem:[%s3408_s25 + $0x44] ss:$8 sps:$4 sm:$0xff]  }
  0x19   : > { %795 = vmatprep.subr.bf16.mxu0 %v3113_v3  ;;  %3028 = vmatprep.subr.bf16.mxu1 %v3113_v3  ;;  %v3124_v10 = vld [vmem:[%s3408_s25 + $0x40] ss:$8 sps:$4 sm:$0xff]   ;;  %v3125_v11 = vld [vmem:[%s3408_s25 + $0x54] ss:$8 sps:$4 sm:$0xff]   ;;  %s2822_s30 = sshll.u32 %s3424_s29, 2  ;;  %s2824_s8 = sshll.u32 %s4871_s16, 6 }
  0x1a   : > { %v3127_v12 = vld [vmem:[%s3408_s25 + $0x50] ss:$8 sps:$4 sm:$0xff]   ;;  %s3433_s7 = scalar_lea.vmem %s4666_s0, %s2822_s30  ;;  %v3128_v13 = vld [vmem:[%s3408_s25 + $0x64] ss:$8 sps:$4 sm:$0xff]   ;;  %v3130_v15 = vld [vmem:[%s3408_s25 + $0x60] ss:$8 sps:$4 sm:$0xff]   ;;  %s326_s9 = sadd.s32 %s2824_s8, %s4873_s26 }
  0x1b   : > { %v3437_v14 = vld [vmem:[%s3433_s7 + $0x4] ss:$8 sps:$4 sm:$0xff]   ;;  %v3131_v17 = vld [vmem:[%s3408_s25 + $0x74] ss:$8 sps:$4 sm:$0xff]   ;;  %v3133_v18 = vld [vmem:[%s3408_s25 + $0x70] ss:$8 sps:$4 sm:$0xff]  }
  0x1c   : > { %796 = vmatpush1.bf16.msra.mxu0 %v3115_v4  ;;  %3044 = vmatpush1.bf16.msra.mxu1 %v3115_v4  ;;  %v3441_v16 = vld [vmem:[%s3433_s7 + $0x84] ss:$8 sps:$4 sm:$0xff]   ;;  %v3136_v20 = vld [vmem:[%s3408_s25 + $0x80] ss:$8 sps:$4 sm:$0xff]   ;;  %v3137_v21 = vld [vmem:[%s3408_s25 + $0x94] ss:$8 sps:$4 sm:$0xff]  }
  0x1d   : > { %797 = vmatprep.subr.bf16.mxu0 %v3116_v5  ;;  %3029 = vmatprep.subr.bf16.mxu1 %v3116_v5  ;;  %v3134_v19 = vld [vmem:[%s3408_s25 + $0x84] ss:$8 sps:$4 sm:$0xff]   ;;  %v3139_v22 = vld [vmem:[%s3408_s25 + $0x90] ss:$8 sps:$4 sm:$0xff]   ;;  %s2825_s10 = sshll.u32 %s326_s9, 3  ;;  %s3060_s14 = smul.u32 6, %s4871_s16 }
  0x1e   : > { %825 = vmatprep.mubr.bf16.mxu0 %v3437_v14  ;;  %905 = vmatprep.mubr.bf16.mxu1 %v3441_v16  ;;  %v3140_v23 = vld [vmem:[%s3408_s25 + $0xa4] ss:$8 sps:$4 sm:$0xff]   ;;  %v3142_v24 = vld [vmem:[%s3408_s25 + $0xa0] ss:$8 sps:$4 sm:$0xff]   ;;  %s3458_s13 = scalar_lea.vmem %s4667_s1, %s2825_s10  ;;  %v3143_v25 = vld [vmem:[%s3408_s25 + $0xb4] ss:$8 sps:$4 sm:$0xff]  }
  0x1f   : > { %v3462_v26 = vld [vmem:[%s3458_s13 + $0x10] sm:$0xff]  ;;  %v3146_v28 = vld [vmem:[%s3408_s25 + $0xc4] ss:$8 sps:$4 sm:$0xff]   ;;  %v3468_v29 = vld [vmem:[%s3458_s13 + $0x18] sm:$0xff]  ;;  %s3972_s23 = scalar_lea.vmem %s4669_s3, %s3060_s14  ;;  %s2830_s16 = sshll.u32 %s3424_s29, 3 }
  0x20   : > { %798 = vmatpush1.bf16.msra.mxu0 %v3118_v6  ;;  %3045 = vmatpush1.bf16.msra.mxu1 %v3118_v6  ;;  %v3145_v27 = vld [vmem:[%s3408_s25 + $0xb0] ss:$8 sps:$4 sm:$0xff]   ;;  %v3471_v30 = vld [vmem:[%s3458_s13] sm:$0xff]  ;;  %v3149_v32 = vld [vmem:[%s3408_s25 + $0xd4] ss:$8 sps:$4 sm:$0xff]   ;;  %s4288_s26 = scalar_lea.vmem %s4670_s4, %s2830_s16 }
  0x21   : > { %799 = vmatprep.subr.bf16.mxu0 %v3119_v7  ;;  %3030 = vmatprep.subr.bf16.mxu1 %v3119_v7  ;;  %v3148_v31 = vld [vmem:[%s3408_s25 + $0xc0] ss:$8 sps:$4 sm:$0xff]   ;;  %v3151_v33 = vld [vmem:[%s3408_s25 + $0xd0] ss:$8 sps:$4 sm:$0xff]   ;;  %v3152_v34 = vld [vmem:[%s3408_s25 + $0xe4] ss:$8 sps:$4 sm:$0xff]  }
  0x22   : > { %998 = vperm.xlu1 %3105, %v3462_v26   ;;  %988 = vperm.xlu0 %3104, %v3471_v30   ;;  %v3480_v35 = vld [vmem:[%s3458_s13 + $0x28] sm:$0xff]  ;;  %v3489_v38 = vld [vmem:[%s3458_s13 + $0x38] sm:$0xff]  ;;  %v3492_v39 = vld [vmem:[%s3458_s13 + $0x20] sm:$0xff] }
  0x23   : > { %v3483_v36 = vld [vmem:[%s3458_s13 + $0x8] sm:$0xff]  ;;  %v3155_v40 = vld [vmem:[%s3408_s25 + $0xf4] ss:$8 sps:$4 sm:$0xff]   ;;  %v3157_v41 = vld [vmem:[%s3408_s25 + $0xf0] ss:$8 sps:$4 sm:$0xff]  }
  0x24   : > { %800 = vmatpush1.bf16.msra.mxu0 %v3121_v8  ;;  %3046 = vmatpush1.bf16.msra.mxu1 %v3121_v8  ;;  %v3154_v37 = vld [vmem:[%s3408_s25 + $0xe0] ss:$8 sps:$4 sm:$0xff]   ;;  %v3166_v43 = vld [vmem:[%s3408_s25 + $0x104] ss:$8 sps:$4 sm:$0xff]   ;;  %v3507_v46 = vld [vmem:[%s3458_s13 + $0x30] sm:$0xff] }
  0x25   : > { %801 = vmatprep.subr.bf16.mxu0 %v3122_v9  ;;  %3031 = vmatprep.subr.bf16.mxu1 %v3122_v9  ;;  %v3499_v42 = vld [vmem:[%s3433_s7] ss:$8 sps:$4 sm:$0xff]   ;;  %v3169_v44 = vld [vmem:[%s3408_s25 + $0x204] ss:$8 sps:$4 sm:$0xff]   ;;  %v3172_v50 = vld [vmem:[%s3408_s25 + $0x114] ss:$8 sps:$4 sm:$0xff]  }
  0x26   : > { %1003 = vperm.xlu1 %3105, %v3468_v29   ;;  %993 = vperm.xlu0 %3104, %v3483_v36   ;;  %v3504_v45 = vld [vmem:[%s3458_s13 + $0x48] sm:$0xff]  ;;  %v3175_v51 = vld [vmem:[%s3408_s25 + $0x214] ss:$8 sps:$4 sm:$0xff]   ;;  %v3170_v53 = vld [vmem:[%s3408_s25 + $0x110] ss:$8 sps:$4 sm:$0xff]  }
  0x27   : > { %v3510_v47 = vld [vmem:[%s3433_s7 + $0x80] ss:$8 sps:$4 sm:$0xff]   ;;  %v3519_v52 = vld [vmem:[%s3433_s7 + $0x14] ss:$8 sps:$4 sm:$0xff]   ;;  %v3173_v55 = vld [vmem:[%s3408_s25 + $0x210] ss:$8 sps:$4 sm:$0xff]  }
  0x28   : > { %802 = vmatpush1.bf16.msra.mxu0 %v3124_v10  ;;  %3047 = vmatpush1.bf16.msra.mxu1 %v3124_v10  ;;  %v3164_v48 = vld [vmem:[%s3408_s25 + $0x100] ss:$8 sps:$4 sm:$0xff]   ;;  %v3523_v54 = vld [vmem:[%s3433_s7 + $0x94] ss:$8 sps:$4 sm:$0xff]   ;;  %v3184_v58 = vld [vmem:[%s3408_s25 + $0x124] ss:$8 sps:$4 sm:$0xff]  }
  0x29   : > { %803 = vmatprep.subr.bf16.mxu0 %v3125_v11  ;;  %3032 = vmatprep.subr.bf16.mxu1 %v3125_v11  ;;  %v3167_v49 = vld [vmem:[%s3408_s25 + $0x200] ss:$8 sps:$4 sm:$0xff]   ;;  %v3529_v56 = vld [vmem:[%s3458_s13 + $0x58] sm:$0xff]  ;;  %v3187_v59 = vld [vmem:[%s3408_s25 + $0x224] ss:$8 sps:$4 sm:$0xff]  }
  0x2a   : > { %1013 = vperm.xlu1 %3105, %v3480_v35   ;;  %1008 = vperm.xlu0 %3104, %v3492_v39   ;;  %v3532_v57 = vld [vmem:[%s3458_s13 + $0x40] sm:$0xff]  ;;  %v3539_v60 = vld [vmem:[%s3433_s7 + $0x10] ss:$8 sps:$4 sm:$0xff]   ;;  %v3190_v0 = vld [vmem:[%s3408_s25 + $0x134] ss:$8 sps:$4 sm:$0xff]  }
  0x2b   : > { %v3542_v61 = vld [vmem:[%s3433_s7 + $0x90] ss:$8 sps:$4 sm:$0xff]   ;;  %v3182_v62 = vld [vmem:[%s3408_s25 + $0x120] ss:$8 sps:$4 sm:$0xff]   ;;  %v3193_v1 = vld [vmem:[%s3408_s25 + $0x234] ss:$8 sps:$4 sm:$0xff]  }
  0x2c   : > { %804 = vmatpush1.bf16.msra.mxu0 %v3127_v12  ;;  %3048 = vmatpush1.bf16.msra.mxu1 %v3127_v12  ;;  %v3185_v63 = vld [vmem:[%s3408_s25 + $0x220] ss:$8 sps:$4 sm:$0xff]   ;;  %v3188_v2 = vld [vmem:[%s3408_s25 + $0x130] ss:$8 sps:$4 sm:$0xff]   ;;  %v3553_v4 = vld [vmem:[%s3433_s7 + $0x24] ss:$8 sps:$4 sm:$0xff]  }
  0x2d   : > { %805 = vmatprep.subr.bf16.mxu0 %v3128_v13  ;;  %3033 = vmatprep.subr.bf16.mxu1 %v3128_v13  ;;  %v3191_v3 = vld [vmem:[%s3408_s25 + $0x230] ss:$8 sps:$4 sm:$0xff]   ;;  %v3556_v5 = vld [vmem:[%s3433_s7 + $0xa4] ss:$8 sps:$4 sm:$0xff]   ;;  %v3571_v10 = vld [vmem:[%s3433_s7 + $0x20] ss:$8 sps:$4 sm:$0xff]  }
  0x2e   : > { %1023 = vperm.xlu1 %3105, %v3489_v38   ;;  %1018 = vperm.xlu0 %3104, %v3507_v46   ;;  %v3561_v6 = vld [vmem:[%s3458_s13 + $0x68] sm:$0xff]  ;;  %v3564_v7 = vld [vmem:[%s3458_s13 + $0x50] sm:$0xff] }
  0x2f   : > { %v3202_v8 = vld [vmem:[%s3408_s25 + $0x144] ss:$8 sps:$4 sm:$0xff]   ;;  %v3574_v11 = vld [vmem:[%s3433_s7 + $0xa0] ss:$8 sps:$4 sm:$0xff]  }
  0x30   : > { %806 = vmatpush1.bf16.msra.mxu0 %v3130_v15  ;;  %3049 = vmatpush1.bf16.msra.mxu1 %v3130_v15  ;;  %v3205_v9 = vld [vmem:[%s3408_s25 + $0x244] ss:$8 sps:$4 sm:$0xff]   ;;  %v3200_v12 = vld [vmem:[%s3408_s25 + $0x140] ss:$8 sps:$4 sm:$0xff]   ;;  %v3208_v15 = vld [vmem:[%s3408_s25 + $0x154] ss:$8 sps:$4 sm:$0xff]  }
  0x31   : > { %807 = vmatprep.subr.bf16.mxu0 %v3131_v17  ;;  %3034 = vmatprep.subr.bf16.mxu1 %v3131_v17  ;;  %v3203_v13 = vld [vmem:[%s3408_s25 + $0x240] ss:$8 sps:$4 sm:$0xff]   ;;  %v3211_v17 = vld [vmem:[%s3408_s25 + $0x254] ss:$8 sps:$4 sm:$0xff]  }
  0x32   : > { %1033 = vperm.xlu1 %3105, %v3504_v45   ;;  %1028 = vperm.xlu0 %3104, %v3532_v57  }
  0x34   : > { %808 = vmatpush1.bf16.msra.mxu0 %v3133_v18  ;;  %3050 = vmatpush1.bf16.msra.mxu1 %v3133_v18  ;;  %v3206_v18 = vld [vmem:[%s3408_s25 + $0x150] ss:$8 sps:$4 sm:$0xff]  }
  0x35   : > { %809 = vmatprep.subr.bf16.mxu0 %v3134_v19  ;;  %3035 = vmatprep.subr.bf16.mxu1 %v3134_v19  ;;  %v3584_v19 = vld [vmem:[%s3433_s7 + $0x34] ss:$8 sps:$4 sm:$0xff]  }
  0x36   : > { %1043 = vperm.xlu1 %3105, %v3529_v56   ;;  %1038 = vperm.xlu0 %3104, %v3564_v7  }
  0x38   : > { %810 = vmatpush1.bf16.msra.mxu0 %v3136_v20  ;;  %3051 = vmatpush1.bf16.msra.mxu1 %v3136_v20  ;;  %v3587_v20 = vld [vmem:[%s3433_s7 + $0xb4] ss:$8 sps:$4 sm:$0xff]  }
  0x39   : > { %811 = vmatprep.subr.bf16.mxu0 %v3137_v21  ;;  %3036 = vmatprep.subr.bf16.mxu1 %v3137_v21  ;;  %v3209_v21 = vld [vmem:[%s3408_s25 + $0x250] ss:$8 sps:$4 sm:$0xff]  }
  0x3a   : > { %1053 = vperm.xlu1 %3105, %v3561_v6  }
  0x3c   : > { %812 = vmatpush1.bf16.msra.mxu0 %v3139_v22  ;;  %3052 = vmatpush1.bf16.msra.mxu1 %v3139_v22  ;;  %v3220_v22 = vld [vmem:[%s3408_s25 + $0x164] ss:$8 sps:$4 sm:$0xff]  }
  0x3d   : > { %813 = vmatprep.subr.bf16.mxu0 %v3140_v23  ;;  %3037 = vmatprep.subr.bf16.mxu1 %v3140_v23  ;;  %v3594_v23 = vld [vmem:[%s3458_s13 + $0x78] sm:$0xff] }
  0x3e   : > { %1063 = vperm.xlu1 %3105, %v3594_v23  }
  0x40   : > { %814 = vmatpush1.bf16.msra.mxu0 %v3142_v24  ;;  %3053 = vmatpush1.bf16.msra.mxu1 %v3142_v24  ;;  %v3597_v24 = vld [vmem:[%s3458_s13 + $0x60] sm:$0xff] }
  0x41   : > { %815 = vmatprep.subr.bf16.mxu0 %v3143_v25  ;;  %3038 = vmatprep.subr.bf16.mxu1 %v3143_v25  ;;  %v3223_v25 = vld [vmem:[%s3408_s25 + $0x264] ss:$8 sps:$4 sm:$0xff]  }
  0x42   : > { %1048 = vperm.xlu0 %3104, %v3597_v24  }
  0x44   : > { %816 = vmatpush1.bf16.msra.mxu0 %v3145_v27  ;;  %3054 = vmatpush1.bf16.msra.mxu1 %v3145_v27  ;;  %v3603_v27 = vld [vmem:[%s3433_s7 + $0x30] ss:$8 sps:$4 sm:$0xff]  }
  0x45   : > { %817 = vmatprep.subr.bf16.mxu0 %v3146_v28  ;;  %3039 = vmatprep.subr.bf16.mxu1 %v3146_v28  ;;  %v3606_v28 = vld [vmem:[%s3433_s7 + $0xb0] ss:$8 sps:$4 sm:$0xff]  }
  0x48   : > { %818 = vmatpush1.bf16.msra.mxu0 %v3148_v31  ;;  %3055 = vmatpush1.bf16.msra.mxu1 %v3148_v31  ;;  %v3218_v31 = vld [vmem:[%s3408_s25 + $0x160] ss:$8 sps:$4 sm:$0xff]  }
  0x49   : > { %819 = vmatprep.subr.bf16.mxu0 %v3149_v32  ;;  %3040 = vmatprep.subr.bf16.mxu1 %v3149_v32  ;;  %v3221_v32 = vld [vmem:[%s3408_s25 + $0x260] ss:$8 sps:$4 sm:$0xff]  }
  0x4c   : > { %820 = vmatpush1.bf16.msra.mxu0 %v3151_v33  ;;  %3056 = vmatpush1.bf16.msra.mxu1 %v3151_v33  ;;  %v3226_v33 = vld [vmem:[%s3408_s25 + $0x174] ss:$8 sps:$4 sm:$0xff]  }
  0x4d   : > { %821 = vmatprep.subr.bf16.mxu0 %v3152_v34  ;;  %3041 = vmatprep.subr.bf16.mxu1 %v3152_v34  ;;  %v3229_v34 = vld [vmem:[%s3408_s25 + $0x274] ss:$8 sps:$4 sm:$0xff]  }
  0x50   : > { %822 = vmatpush1.bf16.msra.mxu0 %v3154_v37  ;;  %3057 = vmatpush1.bf16.msra.mxu1 %v3154_v37  ;;  %v3224_v37 = vld [vmem:[%s3408_s25 + $0x170] ss:$8 sps:$4 sm:$0xff]  }
  0x51   : > { %823 = vmatprep.subr.bf16.mxu0 %v3155_v40  ;;  %3042 = vmatprep.subr.bf16.mxu1 %v3155_v40  ;;  %v3616_v40 = vld [vmem:[%s3433_s7 + $0x44] ss:$8 sps:$4 sm:$0xff]  }
  0x54   : > { %824 = vmatpush1.bf16.msra.mxu0 %v3157_v41  ;;  %3058 = vmatpush1.bf16.msra.mxu1 %v3157_v41  ;;  %v3619_v41 = vld [vmem:[%s3433_s7 + $0xc4] ss:$8 sps:$4 sm:$0xff]  }
  0x55   : > { %1480 = vmatprep.subr.bf16.mxu1 %v3166_v43  ;;  %2135 = vmatprep.subr.bf16.mxu0 %v3169_v44  ;;  %v3227_v43 = vld [vmem:[%s3408_s25 + $0x270] ss:$8 sps:$4 sm:$0xff]   ;;  %v3625_v44 = vld [vmem:[%s3458_s13 + $0x88] sm:$0xff] }
  0x56   : > { %1073 = vperm.xlu1 %3105, %v3625_v44  }
  0x57   : > { %826 = vmatmul.mubr.bf16.vlgmr.msra.gmra.mrb[0].mxu0 %v3499_v42  ;;  %906 = vmatmul.mubr.bf16.vlgmr.msra.gmra.mrb[0].mxu1 %v3510_v47 }
  0x58   : > { %1481 = vmatpush1.bf16.msra.mxu1 %v3164_v48  ;;  %2136 = vmatpush1.bf16.msra.mxu0 %v3167_v49  ;;  %v3628_v48 = vld [vmem:[%s3458_s13 + $0x70] sm:$0xff]  ;;  %v3238_v49 = vld [vmem:[%s3408_s25 + $0x184] ss:$8 sps:$4 sm:$0xff]  }
  0x59   : > { %1482 = vmatprep.subr.bf16.mxu1 %v3172_v50  ;;  %2137 = vmatprep.subr.bf16.mxu0 %v3175_v51  ;;  %v3241_v50 = vld [vmem:[%s3408_s25 + $0x284] ss:$8 sps:$4 sm:$0xff]   ;;  %v3635_v51 = vld [vmem:[%s3433_s7 + $0x40] ss:$8 sps:$4 sm:$0xff]  }
  0x5a   : > { %835 = vmatprep.mubr.bf16.mxu0 %v3519_v52  ;;  %915 = vmatprep.mubr.bf16.mxu1 %v3523_v54 }
  0x5b   : > { %1058 = vperm.xlu0 %3104, %v3628_v48  }
  0x5c   : > { %1483 = vmatpush1.bf16.msra.mxu1 %v3170_v53  ;;  %2138 = vmatpush1.bf16.msra.mxu0 %v3173_v55  ;;  %v3638_v53 = vld [vmem:[%s3433_s7 + $0xc0] ss:$8 sps:$4 sm:$0xff]  }
  0x5d   : > { %1484 = vmatprep.subr.bf16.mxu1 %v3184_v58  ;;  %2139 = vmatprep.subr.bf16.mxu0 %v3187_v59  ;;  %v3236_v55 = vld [vmem:[%s3408_s25 + $0x180] ss:$8 sps:$4 sm:$0xff]   ;;  %v3244_v59 = vld [vmem:[%s3408_s25 + $0x194] ss:$8 sps:$4 sm:$0xff]  }
  0x5e   : > { %v3239_v58 = vld [vmem:[%s3408_s25 + $0x280] ss:$8 sps:$4 sm:$0xff]  }
  0x5f   : > { %836 = vmatmul.mubr.bf16.gmra.mrb[4].mxu0 %v3539_v60  ;;  %916 = vmatmul.mubr.bf16.gmra.mrb[4].mxu1 %v3542_v61 }
  0x60   : > { %1485 = vmatpush1.bf16.msra.mxu1 %v3182_v62  ;;  %2140 = vmatpush1.bf16.msra.mxu0 %v3185_v63  ;;  %v3247_v62 = vld [vmem:[%s3408_s25 + $0x294] ss:$8 sps:$4 sm:$0xff]  }
  0x61   : > { %1486 = vmatprep.subr.bf16.mxu1 %v3190_v0  ;;  %2141 = vmatprep.subr.bf16.mxu0 %v3193_v1  ;;  %v3647_v63 = vld [vmem:[%s3433_s7 + $0x54] ss:$8 sps:$4 sm:$0xff]   ;;  %v3242_v1 = vld [vmem:[%s3408_s25 + $0x190] ss:$8 sps:$4 sm:$0xff]  }
  0x62   : > { %845 = vmatprep.mubr.bf16.mxu0 %v3553_v4  ;;  %925 = vmatprep.mubr.bf16.mxu1 %v3556_v5  ;;  %v3650_v0 = vld [vmem:[%s3433_s7 + $0xd4] ss:$8 sps:$4 sm:$0xff]  }
  0x64   : > { %1487 = vmatpush1.bf16.msra.mxu1 %v3188_v2  ;;  %2142 = vmatpush1.bf16.msra.mxu0 %v3191_v3  ;;  %v3245_v2 = vld [vmem:[%s3408_s25 + $0x290] ss:$8 sps:$4 sm:$0xff]  }
  0x65   : > { %1488 = vmatprep.subr.bf16.mxu1 %v3202_v8  ;;  %2143 = vmatprep.subr.bf16.mxu0 %v3205_v9  ;;  %v3657_v3 = vld [vmem:[%s3458_s13 + $0x98] sm:$0xff]  ;;  %v3660_v8 = vld [vmem:[%s3458_s13 + $0x80] sm:$0xff] }
  0x66   : > { %v3256_v9 = vld [vmem:[%s3408_s25 + $0x1a4] ss:$8 sps:$4 sm:$0xff]   ;;  %1083 = vperm.xlu1 %3105, %v3657_v3   ;;  %1068 = vperm.xlu0 %3104, %v3660_v8  }
  0x67   : > { %846 = vmatmul.mubr.bf16.gmra.mrb[8].mxu0 %v3571_v10  ;;  %926 = vmatmul.mubr.bf16.gmra.mrb[8].mxu1 %v3574_v11 }
  0x68   : > { %1489 = vmatpush1.bf16.msra.mxu1 %v3200_v12  ;;  %2144 = vmatpush1.bf16.msra.mxu0 %v3203_v13  ;;  %v3259_v12 = vld [vmem:[%s3408_s25 + $0x2a4] ss:$8 sps:$4 sm:$0xff]   ;;  %v3667_v13 = vld [vmem:[%s3433_s7 + $0x50] ss:$8 sps:$4 sm:$0xff]  }
  0x69   : > { %1490 = vmatprep.subr.bf16.mxu1 %v3208_v15  ;;  %2145 = vmatprep.subr.bf16.mxu0 %v3211_v17  ;;  %v3670_v15 = vld [vmem:[%s3433_s7 + $0xd0] ss:$8 sps:$4 sm:$0xff]   ;;  %v3254_v17 = vld [vmem:[%s3408_s25 + $0x1a0] ss:$8 sps:$4 sm:$0xff]  }
  0x6a   : > { %855 = vmatprep.mubr.bf16.mxu0 %v3584_v19  ;;  %935 = vmatprep.mubr.bf16.mxu1 %v3587_v20 }
  0x6c   : > { %1491 = vmatpush1.bf16.msra.mxu1 %v3206_v18  ;;  %2146 = vmatpush1.bf16.msra.mxu0 %v3209_v21  ;;  %v3257_v18 = vld [vmem:[%s3408_s25 + $0x2a0] ss:$8 sps:$4 sm:$0xff]   ;;  %v3262_v21 = vld [vmem:[%s3408_s25 + $0x1b4] ss:$8 sps:$4 sm:$0xff]  }
  0x6d   : > { %1492 = vmatprep.subr.bf16.mxu1 %v3220_v22  ;;  %2147 = vmatprep.subr.bf16.mxu0 %v3223_v25  ;;  %v3265_v22 = vld [vmem:[%s3408_s25 + $0x2b4] ss:$8 sps:$4 sm:$0xff]   ;;  %v3679_v25 = vld [vmem:[%s3433_s7 + $0x64] ss:$8 sps:$4 sm:$0xff]  }
  0x6f   : > { %856 = vmatmul.mubr.bf16.gmra.mrb[12].mxu0 %v3603_v27  ;;  %936 = vmatmul.mubr.bf16.gmra.mrb[12].mxu1 %v3606_v28 }
  0x70   : > { %1493 = vmatpush1.bf16.msra.mxu1 %v3218_v31  ;;  %2148 = vmatpush1.bf16.msra.mxu0 %v3221_v32  ;;  %v3682_v31 = vld [vmem:[%s3433_s7 + $0xe4] ss:$8 sps:$4 sm:$0xff]   ;;  %v3260_v32 = vld [vmem:[%s3408_s25 + $0x1b0] ss:$8 sps:$4 sm:$0xff]  }
  0x71   : > { %1494 = vmatprep.subr.bf16.mxu1 %v3226_v33  ;;  %2149 = vmatprep.subr.bf16.mxu0 %v3229_v34  ;;  %v3263_v33 = vld [vmem:[%s3408_s25 + $0x2b0] ss:$8 sps:$4 sm:$0xff]   ;;  %v3689_v34 = vld [vmem:[%s3458_s13 + $0xa8] sm:$0xff] }
  0x72   : > { %865 = vmatprep.mubr.bf16.mxu0 %v3616_v40  ;;  %945 = vmatprep.mubr.bf16.mxu1 %v3619_v41 }
  0x73   : > { %1093 = vperm.xlu1 %3105, %v3689_v34  }
  0x74   : > { %1495 = vmatpush1.bf16.msra.mxu1 %v3224_v37  ;;  %2150 = vmatpush1.bf16.msra.mxu0 %v3227_v43  ;;  %v3692_v37 = vld [vmem:[%s3458_s13 + $0x90] sm:$0xff]  ;;  %v3274_v43 = vld [vmem:[%s3408_s25 + $0x1c4] ss:$8 sps:$4 sm:$0xff]  }
  0x75   : > { %1496 = vmatprep.subr.bf16.mxu1 %v3238_v49  ;;  %2151 = vmatprep.subr.bf16.mxu0 %v3241_v50  ;;  %v3277_v49 = vld [vmem:[%s3408_s25 + $0x2c4] ss:$8 sps:$4 sm:$0xff]   ;;  %v3699_v50 = vld [vmem:[%s3433_s7 + $0x60] ss:$8 sps:$4 sm:$0xff]  }
  0x76   : > { %1078 = vperm.xlu0 %3104, %v3692_v37  }
  0x77   : > { %866 = vmatmul.mubr.bf16.gmra.mrb[16].mxu0 %v3635_v51  ;;  %946 = vmatmul.mubr.bf16.gmra.mrb[16].mxu1 %v3638_v53 }
  0x78   : > { %1497 = vmatpush1.bf16.msra.mxu1 %v3236_v55  ;;  %2152 = vmatpush1.bf16.msra.mxu0 %v3239_v58  ;;  %v3702_v55 = vld [vmem:[%s3433_s7 + $0xe0] ss:$8 sps:$4 sm:$0xff]  }
  0x79   : > { %1498 = vmatprep.subr.bf16.mxu1 %v3244_v59  ;;  %2153 = vmatprep.subr.bf16.mxu0 %v3247_v62  ;;  %4706 = vst [vmem:[#allocation2_spill] sm:$0xff] %v3702_v55  ;;  %v3272_v58 = vld [vmem:[%s3408_s25 + $0x1c0] ss:$8 sps:$4 sm:$0xff]   ;;  %v3280_v62 = vld [vmem:[%s3408_s25 + $0x1d4] ss:$8 sps:$4 sm:$0xff]  }
  0x7a   : > { %875 = vmatprep.mubr.bf16.mxu0 %v3647_v63  ;;  %955 = vmatprep.mubr.bf16.mxu1 %v3650_v0  ;;  %v3275_v59 = vld [vmem:[%s3408_s25 + $0x2c0] ss:$8 sps:$4 sm:$0xff]  }
  0x7c   : > { %1499 = vmatpush1.bf16.msra.mxu1 %v3242_v1  ;;  %2154 = vmatpush1.bf16.msra.mxu0 %v3245_v2  ;;  %v3283_v1 = vld [vmem:[%s3408_s25 + $0x2d4] ss:$8 sps:$4 sm:$0xff]  }
  0x7d   : > { %1500 = vmatprep.subr.bf16.mxu1 %v3256_v9  ;;  %2155 = vmatprep.subr.bf16.mxu0 %v3259_v12  ;;  %v3711_v2 = vld [vmem:[%s3433_s7 + $0x74] ss:$8 sps:$4 sm:$0xff]   ;;  %v3278_v12 = vld [vmem:[%s3408_s25 + $0x1d0] ss:$8 sps:$4 sm:$0xff]  }
  0x7e   : > { %v3714_v9 = vld [vmem:[%s3433_s7 + $0xf4] ss:$8 sps:$4 sm:$0xff]  }
  0x7f   : > { %876 = vmatmul.mubr.bf16.gmra.mrb[20].mxu0 %v3667_v13  ;;  %956 = vmatmul.mubr.bf16.gmra.mrb[20].mxu1 %v3670_v15  ;;  %4707 = vst [vmem:[#allocation3_spill] sm:$0xff] %v3714_v9 }
  0x80   : > { %1501 = vmatpush1.bf16.msra.mxu1 %v3254_v17  ;;  %2156 = vmatpush1.bf16.msra.mxu0 %v3257_v18  ;;  %v3281_v17 = vld [vmem:[%s3408_s25 + $0x2d0] ss:$8 sps:$4 sm:$0xff]  }
  0x81   : > { %1502 = vmatprep.subr.bf16.mxu1 %v3262_v21  ;;  %2157 = vmatprep.subr.bf16.mxu0 %v3265_v22  ;;  %v3721_v18 = vld [vmem:[%s3458_s13 + $0xb8] sm:$0xff]  ;;  %v3724_v21 = vld [vmem:[%s3458_s13 + $0xa0] sm:$0xff] }
  0x82   : > { %885 = vmatprep.mubr.bf16.mxu0 %v3679_v25  ;;  %965 = vmatprep.mubr.bf16.mxu1 %v3682_v31  ;;  %v3292_v22 = vld [vmem:[%s3408_s25 + $0x1e4] ss:$8 sps:$4 sm:$0xff]  }
  0x83   : > { %1103 = vperm.xlu1 %3105, %v3721_v18   ;;  %1088 = vperm.xlu0 %3104, %v3724_v21  }
  0x84   : > { %1503 = vmatpush1.bf16.msra.mxu1 %v3260_v32  ;;  %2158 = vmatpush1.bf16.msra.mxu0 %v3263_v33  ;;  %v3295_v32 = vld [vmem:[%s3408_s25 + $0x2e4] ss:$8 sps:$4 sm:$0xff]   ;;  %v3731_v33 = vld [vmem:[%s3433_s7 + $0x70] ss:$8 sps:$4 sm:$0xff]  }
  0x85   : > { %1504 = vmatprep.subr.bf16.mxu1 %v3274_v43  ;;  %2159 = vmatprep.subr.bf16.mxu0 %v3277_v49  ;;  %v3734_v43 = vld [vmem:[%s3433_s7 + $0xf0] ss:$8 sps:$4 sm:$0xff]   ;;  %v3290_v49 = vld [vmem:[%s3408_s25 + $0x1e0] ss:$8 sps:$4 sm:$0xff]  }
  0x87   : > { %886 = vmatmul.mubr.bf16.gmra.mrb[24].mxu0 %v3699_v50  ;;  %966 = vmatmul.mubr.bf16.gmra.mrb[24].mxu1 %v3702_v55  ;;  %v3747_v55 = vld [vmem:[%s3458_s13 + $0xc8] sm:$0xff] }
  0x88   : > { %1505 = vmatpush1.bf16.msra.mxu1 %v3272_v58  ;;  %2160 = vmatpush1.bf16.msra.mxu0 %v3275_v59  ;;  %v3293_v58 = vld [vmem:[%s3408_s25 + $0x2e0] ss:$8 sps:$4 sm:$0xff]   ;;  %v3298_v59 = vld [vmem:[%s3408_s25 + $0x1f4] ss:$8 sps:$4 sm:$0xff]  }
  0x89   : > { %1506 = vmatprep.subr.bf16.mxu1 %v3280_v62  ;;  %2161 = vmatprep.subr.bf16.mxu0 %v3283_v1  ;;  %v3301_v62 = vld [vmem:[%s3408_s25 + $0x2f4] ss:$8 sps:$4 sm:$0xff]   ;;  %v3296_v1 = vld [vmem:[%s3408_s25 + $0x1f0] ss:$8 sps:$4 sm:$0xff]  }
  0x8a   : > { %895 = vmatprep.mubr.bf16.mxu0 %v3711_v2  ;;  %975 = vmatprep.mubr.bf16.mxu1 %v3714_v9  ;;  %v3299_v9 = vld [vmem:[%s3408_s25 + $0x2f0] ss:$8 sps:$4 sm:$0xff]  }
  0x8b   : > { %1113 = vperm.xlu1 %3105, %v3747_v55  }
  0x8c   : > { %1507 = vmatpush1.bf16.msra.mxu1 %v3278_v12  ;;  %2162 = vmatpush1.bf16.msra.mxu0 %v3281_v17  ;;  %v3750_v12 = vld [vmem:[%s3458_s13 + $0xb0] sm:$0xff]  ;;  %v3757_v17 = vld [vmem:[%s3458_s13 + $0xd8] sm:$0xff] }
  0x8d   : > { %1508 = vmatprep.subr.bf16.mxu1 %v3292_v22  ;;  %2163 = vmatprep.subr.bf16.mxu0 %v3295_v32  ;;  %v3760_v22 = vld [vmem:[%s3458_s13 + $0xc0] sm:$0xff]  ;;  %v3777_v32 = vld [vmem:[%s3458_s13 + $0xf8] sm:$0xff] }
  0x8e   : > { %1098 = vperm.xlu0 %3104, %v3750_v12  }
  0x8f   : > { %896 = vmatmul.mubr.bf16.gmra.mrb[28].mxu0 %v3731_v33  ;;  %976 = vmatmul.mubr.bf16.gmra.mrb[28].mxu1 %v3734_v43 }
  0x90   : > { %1509 = vmatpush1.bf16.msra.mxu1 %v3290_v49  ;;  %2164 = vmatpush1.bf16.msra.mxu0 %v3293_v58  ;;  %v3343_v49 = vmov 1  }
  0x91   : > { %1510 = vmatprep.subr.bf16.mxu1 %v3298_v59  ;;  %2165 = vmatprep.subr.bf16.mxu0 %v3301_v62 }
  0x92   : > { %1512 = vmatprep.mubr.bf16.mxu1 %v3437_v14  ;;  %2167 = vmatprep.mubr.bf16.mxu0 %v3437_v14  ;;  %v3769_v14 = vld [vmem:[%s3458_s13 + $0xe8] sm:$0xff] }
  0x93   : > { %1123 = vperm.xlu1 %3105, %v3757_v17   ;;  %1108 = vperm.xlu0 %3104, %v3760_v22  }
  0x94   : > { %1511 = vmatpush1.bf16.msra.mxu1 %v3296_v1  ;;  %2166 = vmatpush1.bf16.msra.mxu0 %v3299_v9  ;;  %v3772_v9 = vld [vmem:[%s3458_s13 + $0xd0] sm:$0xff] }
  0x97   : > { %1513 = vmatmul.mubr.bf16.vlgmr.msra.gmra.mrb[32].mxu1 %v3499_v42  ;;  %2168 = vmatmul.mubr.bf16.vlgmr.msra.gmra.mrb[32].mxu0 %v3499_v42  ;;  %v3780_v42 = vld [vmem:[%s3458_s13 + $0xe0] sm:$0xff] }
  0x98   : > { %1522 = vmatprep.mubr.bf16.mxu1 %v3519_v52  ;;  %2177 = vmatprep.mubr.bf16.mxu0 %v3519_v52  ;;  %v3789_v52 = vld [vmem:[%s3458_s13 + $0xf0] sm:$0xff] }
  0x99   : > { %1133 = vperm.xlu1 %3105, %v3769_v14   ;;  %1118 = vperm.xlu0 %3104, %v3772_v9  }
  0x9d   : > { %1143 = vperm.xlu1 %3105, %v3777_v32   ;;  %1128 = vperm.xlu0 %3104, %v3780_v42  }
  0x9f   : > { %1523 = vmatmul.mubr.bf16.gmra.mrb[36].mxu1 %v3539_v60  ;;  %2178 = vmatmul.mubr.bf16.gmra.mrb[36].mxu0 %v3539_v60 }
  0xa0   : > { %1532 = vmatprep.mubr.bf16.mxu1 %v3553_v4  ;;  %2187 = vmatprep.mubr.bf16.mxu0 %v3553_v4 }
  0xa1   : > { %3107 = vset.pattern.permute.xlu1 %v3343_v49  ;;  %1138 = vperm.xlu0 %3104, %v3789_v52   ;;  %v3831_v60 = vpop.permute.xlu1 %998 }
  0xa2   : > { %1678 = vperm.xlu1 %3107, %v3483_v36  }
  0xa5   : > { %3106 = vset.pattern.permute.xlu0 %v3343_v49  ;;  %v3839_v4 = vpop.permute.xlu1 %1003 }
  0xa6   : > { %1682 = vperm.xlu1 %3107, %v3462_v26   ;;  %1674 = vperm.xlu0 %3106, %v3471_v30  }
  0xa7   : > { %1533 = vmatmul.mubr.bf16.gmra.mrb[40].mxu1 %v3571_v10  ;;  %2188 = vmatmul.mubr.bf16.gmra.mrb[40].mxu0 %v3571_v10  ;;  %v3841_v10 = vpop.permute.xlu0 %988 }
  0xa8   : > { %1542 = vmatprep.mubr.bf16.mxu1 %v3584_v19  ;;  %2197 = vmatprep.mubr.bf16.mxu0 %v3584_v19 }
  0xa9   : > { %v3847_v19 = vpop.permute.xlu1 %1013 }
  0xaa   : > { %1690 = vperm.xlu1 %3107, %v3492_v39   ;;  %1686 = vperm.xlu0 %3106, %v3468_v29  }
  0xae   : > { %1698 = vperm.xlu1 %3107, %v3507_v46   ;;  %1694 = vperm.xlu0 %3106, %v3480_v35  }
  0xaf   : > { %1543 = vmatmul.mubr.bf16.gmra.mrb[44].mxu1 %v3603_v27  ;;  %2198 = vmatmul.mubr.bf16.gmra.mrb[44].mxu0 %v3603_v27  ;;  %v3849_v27 = vpop.permute.xlu0 %993 }
  0xb0   : > { %1552 = vmatprep.mubr.bf16.mxu1 %v3616_v40  ;;  %2207 = vmatprep.mubr.bf16.mxu0 %v3616_v40 }
  0xb2   : > { %1706 = vperm.xlu1 %3107, %v3532_v57   ;;  %1702 = vperm.xlu0 %3106, %v3489_v38  }
  0xb3   : > { %v3859_v40 = vpop.permute.xlu0 %1008 }
  0xb6   : > { %1714 = vperm.xlu1 %3107, %v3564_v7   ;;  %1710 = vperm.xlu0 %3106, %v3504_v45  }
  0xb7   : > { %1553 = vmatmul.mubr.bf16.gmra.mrb[48].mxu1 %v3635_v51  ;;  %2208 = vmatmul.mubr.bf16.gmra.mrb[48].mxu0 %v3635_v51  ;;  %v3344_v51 = vmov 2  }
  0xb8   : > { %1562 = vmatprep.mubr.bf16.mxu1 %v3647_v63  ;;  %2217 = vmatprep.mubr.bf16.mxu0 %v3647_v63 }
  0xba   : > { %1722 = vperm.xlu1 %3107, %v3597_v24   ;;  %1718 = vperm.xlu0 %3106, %v3529_v56  }
  0xbe   : > { %1730 = vperm.xlu1 %3107, %v3628_v48   ;;  %1726 = vperm.xlu0 %3106, %v3561_v6  }
  0xbf   : > { %1563 = vmatmul.mubr.bf16.gmra.mrb[52].mxu1 %v3667_v13  ;;  %2218 = vmatmul.mubr.bf16.gmra.mrb[52].mxu0 %v3667_v13 }
  0xc0   : > { %1572 = vmatprep.mubr.bf16.mxu1 %v3679_v25  ;;  %2227 = vmatprep.mubr.bf16.mxu0 %v3679_v25 }
  0xc2   : > { %1738 = vperm.xlu1 %3107, %v3660_v8   ;;  %1734 = vperm.xlu0 %3106, %v3594_v23  }
  0xc6   : > { %1746 = vperm.xlu1 %3107, %v3692_v37   ;;  %1742 = vperm.xlu0 %3106, %v3625_v44  }
  0xc7   : > { %1573 = vmatmul.mubr.bf16.gmra.mrb[56].mxu1 %v3699_v50  ;;  %2228 = vmatmul.mubr.bf16.gmra.mrb[56].mxu0 %v3699_v50 }
  0xc8   : > { %1582 = vmatprep.mubr.bf16.mxu1 %v3711_v2  ;;  %2237 = vmatprep.mubr.bf16.mxu0 %v3711_v2 }
  0xca   : > { %1754 = vperm.xlu1 %3107, %v3724_v21   ;;  %1750 = vperm.xlu0 %3106, %v3657_v3  }
  0xce   : > { %1762 = vperm.xlu1 %3107, %v3750_v12   ;;  %1758 = vperm.xlu0 %3106, %v3689_v34  }
  0xcf   : > { %1583 = vmatmul.mubr.bf16.gmra.mrb[60].mxu1 %v3731_v33  ;;  %2238 = vmatmul.mubr.bf16.gmra.mrb[60].mxu0 %v3731_v33 }
  0xd0   : > { %1592 = vmatprep.mubr.bf16.mxu1 %v3441_v16  ;;  %2247 = vmatprep.mubr.bf16.mxu0 %v3441_v16  ;;  %v3857_v16 = vpop.permute.xlu1 %1023 }
  0xd2   : > { %1770 = vperm.xlu1 %3107, %v3760_v22   ;;  %1766 = vperm.xlu0 %3106, %v3721_v18  }
  0xd6   : > { %1778 = vperm.xlu1 %3107, %v3772_v9   ;;  %1774 = vperm.xlu0 %3106, %v3747_v55  }
  0xd7   : > { %1593 = vmatmul.mubr.bf16.gmra.mrb[64].mxu1 %v3510_v47  ;;  %2248 = vmatmul.mubr.bf16.gmra.mrb[64].mxu0 %v3510_v47  ;;  %v3869_v47 = vpop.permute.xlu1 %1033 }
  0xd8   : > { %1602 = vmatprep.mubr.bf16.mxu1 %v3523_v54  ;;  %2257 = vmatprep.mubr.bf16.mxu0 %v3523_v54  ;;  %v3871_v54 = vpop.permute.xlu0 %1018 }
  0xda   : > { %1786 = vperm.xlu1 %3107, %v3780_v42   ;;  %1782 = vperm.xlu0 %3106, %v3757_v17  }
  0xde   : > { %1794 = vperm.xlu1 %3107, %v3789_v52   ;;  %1790 = vperm.xlu0 %3106, %v3769_v14  }
  0xdf   : > { %1603 = vmatmul.mubr.bf16.gmra.mrb[68].mxu1 %v3542_v61  ;;  %2258 = vmatmul.mubr.bf16.gmra.mrb[68].mxu0 %v3542_v61  ;;  %v3879_v61 = vpop.permute.xlu1 %1043 }
  0xe0   : > { %1612 = vmatprep.mubr.bf16.mxu1 %v3556_v5  ;;  %2267 = vmatprep.mubr.bf16.mxu0 %v3556_v5  ;;  %4708 = vst [vmem:[#allocation4_spill] sm:$0xff] %v3879_v61  ;;  %v3881_v5 = vpop.permute.xlu0 %1028 }
  0xe2   : > { %3108 = vset.pattern.permute.xlu1 %v3344_v51  ;;  %1798 = vperm.xlu0 %3106, %v3777_v32  }
  0xe3   : > { %2329 = vperm.xlu1 %3108, %v3471_v30   ;;  %v3886_v30 = vpop.permute.xlu1 %1053 }
  0xe4   : > { %4709 = vst [vmem:[#allocation5_spill] sm:$0xff] %v3886_v30  ;;  %v3888_v63 = vpop.permute.xlu0 %1038 }
  0xe5   : > { %4710 = vst [vmem:[#allocation6_spill] sm:$0xff] %v3888_v63 }
  0xe6   : > { %3109 = vset.pattern.permute.xlu0 %v3344_v51 }
  0xe7   : > { %1613 = vmatmul.mubr.bf16.gmra.mrb[72].mxu1 %v3574_v11  ;;  %2268 = vmatmul.mubr.bf16.gmra.mrb[72].mxu0 %v3574_v11 }
  0xe8   : > { %1622 = vmatprep.mubr.bf16.mxu1 %v3587_v20  ;;  %2277 = vmatprep.mubr.bf16.mxu0 %v3587_v20 }
  0xe9   : > { %2337 = vperm.xlu1 %3108, %v3462_v26   ;;  %2333 = vperm.xlu0 %3109, %v3483_v36   ;;  %v3896_v26 = vpop.permute.xlu1 %1063  ;;  %v3898_v36 = vpop.permute.xlu0 %1048 }
  0xea   : > { %4711 = vst [vmem:[#allocation7_spill] sm:$0xff] %v3896_v26  ;;  %4712 = vst [vmem:[#allocation8_spill] sm:$0xff] %v3898_v36 }
  0xed   : > { %2341 = vperm.xlu1 %3108, %v3468_v29   ;;  %2345 = vperm.xlu0 %3109, %v3492_v39   ;;  %v3908_v29 = vpop.permute.xlu1 %1073 }
  0xef   : > { %1623 = vmatmul.mubr.bf16.gmra.mrb[76].mxu1 %v3606_v28  ;;  %2278 = vmatmul.mubr.bf16.gmra.mrb[76].mxu0 %v3606_v28 }
  0xf0   : > { %1632 = vmatprep.mubr.bf16.mxu1 %v3619_v41  ;;  %2287 = vmatprep.mubr.bf16.mxu0 %v3619_v41 }
  0xf1   : > { %2349 = vperm.xlu1 %3108, %v3480_v35   ;;  %2353 = vperm.xlu0 %3109, %v3507_v46   ;;  %v3910_v35 = vpop.permute.xlu0 %1058 }
  0xf2   : > { %4713 = vst [vmem:[#allocation9_spill] sm:$0xff] %v3910_v35 }
  0xf5   : > { %2357 = vperm.xlu1 %3108, %v3489_v38   ;;  %2361 = vperm.xlu0 %3109, %v3532_v57   ;;  %v3918_v38 = vpop.permute.xlu1 %1083  ;;  %v3920_v39 = vpop.permute.xlu0 %1068  ;;  %v4715_v57 = vld [vmem:[#allocation3_spill] sm:$0xff] }
  0xf7   : > { %1633 = vmatmul.mubr.bf16.gmra.mrb[80].mxu1 %v3638_v53  ;;  %2288 = vmatmul.mubr.bf16.gmra.mrb[80].mxu0 %v3638_v53 }
  0xf8   : > { %1642 = vmatprep.mubr.bf16.mxu1 %v3650_v0  ;;  %2297 = vmatprep.mubr.bf16.mxu0 %v3650_v0 }
  0xf9   : > { %2365 = vperm.xlu1 %3108, %v3504_v45   ;;  %2369 = vperm.xlu0 %3109, %v3564_v7   ;;  %v3926_v45 = vpop.permute.xlu1 %1093  ;;  %v3928_v46 = vpop.permute.xlu0 %1078 }
  0xfd   : > { %2373 = vperm.xlu1 %3108, %v3529_v56   ;;  %2377 = vperm.xlu0 %3109, %v3597_v24   ;;  %v4714_v56 = vld [vmem:[#allocation2_spill] sm:$0xff] }
  0xff   : > { %1643 = vmatmul.mubr.bf16.gmra.mrb[84].mxu1 %v3670_v15  ;;  %2298 = vmatmul.mubr.bf16.gmra.mrb[84].mxu0 %v3670_v15  ;;  %v461_v15 = vld [vmem:[%s3972_s23] sm:$0x3] }
 0x100   : > { %1652 = vmatprep.mubr.bf16.mxu1 %v3682_v31  ;;  %2307 = vmatprep.mubr.bf16.mxu0 %v3682_v31 }
 0x101   : > { %2381 = vperm.xlu1 %3108, %v3561_v6   ;;  %2385 = vperm.xlu0 %3109, %v3628_v48  }
 0x102   : > { %v3936_v6 = vpop.permute.xlu1 %1103  ;;  %v3938_v7 = vpop.permute.xlu0 %1088 }
 0x105   : > { %2389 = vperm.xlu1 %3108, %v3594_v23   ;;  %2393 = vperm.xlu0 %3109, %v3660_v8  }
 0x107   : > { %1653 = vmatmul.mubr.bf16.gmra.mrb[88].mxu1 %v4714_v56  ;;  %2308 = vmatmul.mubr.bf16.gmra.mrb[88].mxu0 %v4714_v56 }
 0x108   : > { %1662 = vmatprep.mubr.bf16.mxu1 %v4715_v57  ;;  %2317 = vmatprep.mubr.bf16.mxu0 %v4715_v57 }
 0x109   : > { %2397 = vperm.xlu1 %3108, %v3625_v44   ;;  %2401 = vperm.xlu0 %3109, %v3692_v37   ;;  %v463_v44 = vlaneseq }
 0x10a   : > { %v3946_v11 = vpop.permute.xlu1 %1113 }
 0x10b   : > { %v464_v0 = vshrl.u32 %v463_v44, 7 }
 0x10d   : > { %2405 = vperm.xlu1 %3108, %v3657_v3   ;;  %2409 = vperm.xlu0 %3109, %v3724_v21   ;;  %v3948_v20 = vpop.permute.xlu0 %1098  ;;  %v3976_v3 = vsub.s32 0, %v464_v0  ;;  %v3983_v25 = vsub.s32 1, %v464_v0 }
 0x10f   : > { %1663 = vmatmul.mubr.bf16.gmra.mrb[92].mxu1 %v3734_v43  ;;  %2318 = vmatmul.mubr.bf16.gmra.mrb[92].mxu0 %v3734_v43  ;;  %v3988_v31 = vrot.slane %v461_v15, %v3976_v3 }
 0x111   : > { %2413 = vperm.xlu1 %3108, %v3689_v34   ;;  %2417 = vperm.xlu0 %3109, %v3750_v12   ;;  %v3991_v34 = vrot.slane %v461_v15, %v3983_v25 }
 0x112   : > { %v3952_v23 = vpop.permute.xlu1 %1123  ;;  %v3954_v24 = vpop.permute.xlu0 %1108 }
 0x115   : > { %2421 = vperm.xlu1 %3108, %v3721_v18   ;;  %2425 = vperm.xlu0 %3109, %v3760_v22  }
 0x118   : > { %v3958_v28 = vpop.permute.xlu1 %1133  ;;  %v3960_v41 = vpop.permute.xlu0 %1118 }
 0x119   : > { %2429 = vperm.xlu1 %3108, %v3747_v55   ;;  %4716 = vst [vmem:[#allocation2_spill] sm:$0xff] %v3958_v28  ;;  %2433 = vperm.xlu0 %3109, %v3772_v9  }
 0x11c   : > { %v3965_v48 = vpop.permute.xlu1 %1143  ;;  %v3967_v53 = vpop.permute.xlu0 %1128 }
 0x11d   : > { %2437 = vperm.xlu1 %3108, %v3757_v17   ;;  %4717 = vst [vmem:[#allocation3_spill] sm:$0xff] %v3965_v48  ;;  %2441 = vperm.xlu0 %3109, %v3780_v42  }
 0x120   : > { %v3978_v8 = vpop.permute.xlu0 %1138 }
 0x121   : > { %2445 = vperm.xlu1 %3108, %v3769_v14   ;;  %v3980_v13 = vpop.permute.xlu1 %1678  ;;  %2449 = vperm.xlu0 %3109, %v3789_v52  }
 0x125   : > { %2453 = vperm.xlu1 %3108, %v3777_v32   ;;  %v3993_v37 = vpop.permute.xlu1 %1682  ;;  %v3995_v50 = vpop.permute.xlu0 %1674 }
 0x129   : > { %v4021_v42 = vpop.permute.xlu1 %1690  ;;  %v4023_v52 = vpop.permute.xlu0 %1686 }
 0x12a   : > { %v3997_v55 = vpop.f32.mrb[0].mxu0  ;;  %v907_v2 = vpop.f32.mrb[0].mxu1 }
 0x12b   : > { %v908_v18 = vadd.f32 %v907_v2, %v3988_v31  ;;  %v4000_v21 = vpop.f32.mrb[1].mxu0  ;;  %v909_v33 = vpop.f32.mrb[1].mxu1 }
 0x12c   : > { %v910_v43 = vadd.f32 %v909_v33, %v3991_v34  ;;  %v4003_v58 = vpop.f32.mrb[2].mxu0  ;;  %v911_v59 = vpop.f32.mrb[2].mxu1 }
 0x12d   : > { %v4006_v62 = vmul.f32 %v3920_v39, %v908_v18  ;;  %v912_v1 = vadd.f32 %v911_v59, %v3988_v31  ;;  %v4009_v12 = vpop.f32.mrb[3].mxu0  ;;  %v913_v17 = vpop.f32.mrb[3].mxu1 }
 0x12e   : > { %v4012_v22 = vmul.f32 %v3920_v39, %v910_v43  ;;  %v914_v14 = vadd.f32 %v913_v17, %v3991_v34  ;;  %v4045_v17 = vpop.permute.xlu0 %1694 }
 0x12f   : > { %4718 = vst [vmem:[#allocation10_spill] sm:$0xff] %v4006_v62  ;;  %v4016_v9 = vmul.f32 %v3908_v29, %v912_v1  ;;  %v4043_v1 = vpop.permute.xlu1 %1698 }
 0x130   : > { %4719 = vst [vmem:[#allocation11_spill] sm:$0xff] %v4012_v22  ;;  %v4019_v32 = vmul.f32 %v3908_v29, %v914_v14 }
 0x131   : > { %4720 = vst [vmem:[#allocation12_spill] sm:$0xff] %v4016_v9 }
 0x132   : > { %4721 = vst [vmem:[#allocation13_spill] sm:$0xff] %v4019_v32  ;;  %v4025_v49 = vpop.f32.mrb[4].mxu0  ;;  %v917_v51 = vpop.f32.mrb[4].mxu1 }
 0x133   : > { %v918_v56 = vadd.f32 %v917_v51, %v3988_v31  ;;  %v4028_v57 = vpop.f32.mrb[5].mxu0  ;;  %v919_v39 = vpop.f32.mrb[5].mxu1 }
 0x134   : > { %v920_v44 = vadd.f32 %v919_v39, %v3991_v34  ;;  %v4031_v0 = vpop.f32.mrb[6].mxu0  ;;  %v921_v15 = vpop.f32.mrb[6].mxu1 }
 0x135   : > { %v4034_v29 = vmul.f32 %v3928_v46, %v918_v56  ;;  %v922_v2 = vadd.f32 %v921_v15, %v3988_v31  ;;  %v4037_v18 = vpop.f32.mrb[7].mxu0  ;;  %v923_v33 = vpop.f32.mrb[7].mxu1 }
 0x136   : > { %v4040_v43 = vmul.f32 %v3928_v46, %v920_v44  ;;  %v924_v59 = vadd.f32 %v923_v33, %v3991_v34  ;;  %v4053_v56 = vpop.permute.xlu1 %1706  ;;  %v4057_v48 = vpop.permute.xlu0 %1702 }
 0x137   : > { %4722 = vst [vmem:[#allocation14_spill] sm:$0xff] %v4034_v29  ;;  %v4048_v14 = vmul.f32 %v3918_v38, %v922_v2 }
 0x138   : > { %4723 = vst [vmem:[#allocation15_spill] sm:$0xff] %v4040_v43  ;;  %v4051_v51 = vmul.f32 %v3918_v38, %v924_v59 }
 0x139   : > { %4724 = vst [vmem:[#allocation16_spill] sm:$0xff] %v4048_v14 }
 0x13a   : > { %4725 = vst [vmem:[#allocation17_spill] sm:$0xff] %v4051_v51  ;;  %v4055_v39 = vpop.f32.mrb[8].mxu0  ;;  %v927_v15 = vpop.f32.mrb[8].mxu1 }
 0x13b   : > { %v928_v46 = vadd.f32 %v927_v15, %v3988_v31  ;;  %v4060_v44 = vpop.f32.mrb[9].mxu0  ;;  %v929_v33 = vpop.f32.mrb[9].mxu1 }
 0x13c   : > { %v930_v28 = vadd.f32 %v929_v33, %v3991_v34  ;;  %v4063_v43 = vpop.f32.mrb[10].mxu0  ;;  %v931_v2 = vpop.f32.mrb[10].mxu1 }
 0x13d   : > { %v4066_v38 = vmul.f32 %v3938_v7, %v928_v46  ;;  %v932_v59 = vadd.f32 %v931_v2, %v3988_v31  ;;  %v4069_v51 = vpop.f32.mrb[11].mxu0  ;;  %v933_v14 = vpop.f32.mrb[11].mxu1 }
 0x13e   : > { %v4072_v29 = vmul.f32 %v3938_v7, %v930_v28  ;;  %v934_v15 = vadd.f32 %v933_v14, %v3991_v34  ;;  %v4075_v32 = vpop.permute.xlu1 %1714  ;;  %v4077_v9 = vpop.permute.xlu0 %1710 }
 0x13f   : > { %4726 = vst [vmem:[#allocation18_spill] sm:$0xff] %v4066_v38  ;;  %4728 = vst [vmem:[#allocation20_spill] sm:$0xff] %v4075_v32  ;;  %v4080_v33 = vmul.f32 %v3926_v45, %v932_v59 }
 0x140   : > { %4727 = vst [vmem:[#allocation19_spill] sm:$0xff] %v4072_v29  ;;  %4729 = vst [vmem:[#allocation21_spill] sm:$0xff] %v4077_v9  ;;  %v4083_v46 = vmul.f32 %v3926_v45, %v934_v15 }
 0x141   : > { %4730 = vst [vmem:[#allocation22_spill] sm:$0xff] %v4080_v33 }
 0x142   : > { %4731 = vst [vmem:[#allocation23_spill] sm:$0xff] %v4083_v46  ;;  %v4085_v38 = vpop.f32.mrb[12].mxu0  ;;  %v937_v2 = vpop.f32.mrb[12].mxu1 }
 0x143   : > { %v4087_v22 = vpop.permute.xlu1 %1722  ;;  %v938_v7 = vadd.f32 %v937_v2, %v3988_v31  ;;  %v4090_v28 = vpop.permute.xlu0 %1718 }
 0x144   : > { %4732 = vst [vmem:[#allocation24_spill] sm:$0xff] %v4087_v22  ;;  %4733 = vst [vmem:[#allocation25_spill] sm:$0xff] %v4090_v28  ;;  %v4092_v14 = vpop.f32.mrb[13].mxu0  ;;  %v939_v29 = vpop.f32.mrb[13].mxu1 }
 0x145   : > { %v4095_v62 = vmul.f32 %v3948_v20, %v938_v7  ;;  %v940_v59 = vadd.f32 %v939_v29, %v3991_v34  ;;  %v4098_v33 = vpop.f32.mrb[14].mxu0  ;;  %v941_v45 = vpop.f32.mrb[14].mxu1 }
 0x146   : > { %v942_v15 = vadd.f32 %v941_v45, %v3988_v31  ;;  %v4101_v46 = vpop.f32.mrb[15].mxu0  ;;  %v943_v26 = vpop.f32.mrb[15].mxu1 }
 0x147   : > { %4734 = vst [vmem:[#allocation26_spill] sm:$0xff] %v4095_v62  ;;  %v4104_v2 = vmul.f32 %v3948_v20, %v940_v59  ;;  %v944_v35 = vadd.f32 %v943_v26, %v3991_v34  ;;  %v4107_v30 = vpop.permute.xlu1 %1730  ;;  %v4109_v22 = vpop.permute.xlu0 %1726 }
 0x148   : > { %4736 = vst [vmem:[#allocation28_spill] sm:$0xff] %v4107_v30  ;;  %4737 = vst [vmem:[#allocation29_spill] sm:$0xff] %v4109_v22  ;;  %v4112_v7 = vmul.f32 %v3936_v6, %v942_v15 }
 0x149   : > { %4735 = vst [vmem:[#allocation27_spill] sm:$0xff] %v4104_v2  ;;  %v4115_v29 = vmul.f32 %v3936_v6, %v944_v35 }
 0x14a   : > { %4738 = vst [vmem:[#allocation30_spill] sm:$0xff] %v4112_v7  ;;  %v4117_v62 = vpop.f32.mrb[16].mxu0  ;;  %v947_v45 = vpop.f32.mrb[16].mxu1 }
 0x14b   : > { %4739 = vst [vmem:[#allocation31_spill] sm:$0xff] %v4115_v29  ;;  %v4119_v36 = vpop.permute.xlu1 %1738  ;;  %v948_v20 = vadd.f32 %v947_v45, %v3988_v31  ;;  %v4122_v59 = vpop.permute.xlu0 %1734 }
 0x14c   : > { %4740 = vst [vmem:[#allocation32_spill] sm:$0xff] %v4119_v36  ;;  %4741 = vst [vmem:[#allocation33_spill] sm:$0xff] %v4122_v59  ;;  %v4124_v26 = vpop.f32.mrb[17].mxu0  ;;  %v949_v2 = vpop.f32.mrb[17].mxu1 }
 0x14d   : > { %v4127_v30 = vmul.f32 %v3954_v24, %v948_v20  ;;  %v950_v15 = vadd.f32 %v949_v2, %v3991_v34  ;;  %v4130_v7 = vpop.f32.mrb[18].mxu0  ;;  %v951_v35 = vpop.f32.mrb[18].mxu1 }
 0x14e   : > { %v952_v6 = vadd.f32 %v951_v35, %v3988_v31  ;;  %v4133_v29 = vpop.f32.mrb[19].mxu0  ;;  %v953_v36 = vpop.f32.mrb[19].mxu1 }
 0x14f   : > { %4742 = vst [vmem:[#allocation34_spill] sm:$0xff] %v4127_v30  ;;  %v4136_v45 = vmul.f32 %v3954_v24, %v950_v15  ;;  %v954_v59 = vadd.f32 %v953_v36, %v3991_v34  ;;  %v4139_v22 = vpop.permute.xlu1 %1746  ;;  %v4141_v28 = vpop.permute.xlu0 %1742 }
 0x150   : > { %4744 = vst [vmem:[#allocation36_spill] sm:$0xff] %v4139_v22  ;;  %4745 = vst [vmem:[#allocation37_spill] sm:$0xff] %v4141_v28  ;;  %v4144_v20 = vmul.f32 %v3946_v11, %v952_v6 }
 0x151   : > { %4743 = vst [vmem:[#allocation35_spill] sm:$0xff] %v4136_v45  ;;  %v4147_v2 = vmul.f32 %v3946_v11, %v954_v59 }
 0x152   : > { %4746 = vst [vmem:[#allocation38_spill] sm:$0xff] %v4144_v20  ;;  %v4149_v30 = vpop.f32.mrb[20].mxu0  ;;  %v957_v35 = vpop.f32.mrb[20].mxu1 }
 0x153   : > { %4747 = vst [vmem:[#allocation39_spill] sm:$0xff] %v4147_v2  ;;  %4748 = vst [vmem:[#allocation40_spill] sm:$0xff] %v4149_v30  ;;  %v4151_v61 = vpop.permute.xlu1 %1754  ;;  %v958_v24 = vadd.f32 %v957_v35, %v3988_v31  ;;  %v4154_v15 = vpop.permute.xlu0 %1750 }
 0x154   : > { %4749 = vst [vmem:[#allocation41_spill] sm:$0xff] %v4151_v61  ;;  %4750 = vst [vmem:[#allocation42_spill] sm:$0xff] %v4154_v15  ;;  %v4156_v36 = vpop.f32.mrb[21].mxu0  ;;  %v959_v45 = vpop.f32.mrb[21].mxu1 }
 0x155   : > { %4751 = vst [vmem:[#allocation43_spill] sm:$0xff] %v4156_v36  ;;  %v4159_v22 = vmul.f32 %v3960_v41, %v958_v24  ;;  %v960_v6 = vadd.f32 %v959_v45, %v3991_v34  ;;  %v4162_v20 = vpop.f32.mrb[22].mxu0  ;;  %v961_v11 = vpop.f32.mrb[22].mxu1 }
 0x156   : > { %4753 = vst [vmem:[#allocation45_spill] sm:$0xff] %v4162_v20  ;;  %v962_v59 = vadd.f32 %v961_v11, %v3988_v31  ;;  %v4165_v2 = vpop.f32.mrb[23].mxu0  ;;  %v963_v61 = vpop.f32.mrb[23].mxu1 }
 0x157   : > { %4752 = vst [vmem:[#allocation44_spill] sm:$0xff] %v4159_v22  ;;  %4754 = vst [vmem:[#allocation46_spill] sm:$0xff] %v4165_v2  ;;  %v4168_v35 = vmul.f32 %v3960_v41, %v960_v6  ;;  %v964_v15 = vadd.f32 %v963_v61, %v3991_v34  ;;  %v4171_v28 = vpop.permute.xlu1 %1762  ;;  %v4173_v32 = vpop.permute.xlu0 %1758 }
 0x158   : > { %4756 = vst [vmem:[#allocation48_spill] sm:$0xff] %v4171_v28  ;;  %4757 = vst [vmem:[#allocation49_spill] sm:$0xff] %v4173_v32  ;;  %v4176_v24 = vmul.f32 %v3952_v23, %v962_v59 }
 0x159   : > { %4755 = vst [vmem:[#allocation47_spill] sm:$0xff] %v4168_v35  ;;  %v4179_v45 = vmul.f32 %v3952_v23, %v964_v15 }
 0x15a   : > { %4758 = vst [vmem:[#allocation50_spill] sm:$0xff] %v4176_v24  ;;  %v4181_v22 = vpop.f32.mrb[24].mxu0  ;;  %v967_v11 = vpop.f32.mrb[24].mxu1 }
 0x15b   : > { %4759 = vst [vmem:[#allocation51_spill] sm:$0xff] %v4179_v45  ;;  %4760 = vst [vmem:[#allocation52_spill] sm:$0xff] %v4181_v22  ;;  %v4183_v2 = vpop.permute.xlu1 %1770  ;;  %v968_v41 = vadd.f32 %v967_v11, %v3988_v31  ;;  %v4186_v6 = vpop.permute.xlu0 %1766 }
 0x15c   : > { %4761 = vst [vmem:[#allocation53_spill] sm:$0xff] %v4183_v2  ;;  %4762 = vst [vmem:[#allocation54_spill] sm:$0xff] %v4186_v6  ;;  %v4188_v61 = vpop.f32.mrb[25].mxu0  ;;  %v969_v35 = vpop.f32.mrb[25].mxu1 }
 0x15d   : > { %4763 = vst [vmem:[#allocation55_spill] sm:$0xff] %v4188_v61  ;;  %v4191_v28 = vmul.f32 %v3967_v53, %v968_v41  ;;  %v970_v59 = vadd.f32 %v969_v35, %v3991_v34  ;;  %v4194_v23 = vpop.f32.mrb[26].mxu0  ;;  %v971_v15 = vpop.f32.mrb[26].mxu1 }
 0x15e   : > { %4765 = vst [vmem:[#allocation57_spill] sm:$0xff] %v4194_v23  ;;  %v4197_v45 = vadd.f32 %v971_v15, %v3988_v31  ;;  %v4199_v24 = vpop.f32.mrb[27].mxu0  ;;  %v973_v11 = vpop.f32.mrb[27].mxu1 }
 0x15f   : > { %4764 = vst [vmem:[#allocation56_spill] sm:$0xff] %v4191_v28  ;;  %4767 = vst [vmem:[#allocation59_spill] sm:$0xff] %v4199_v24  ;;  %v4202_v2 = vmul.f32 %v3967_v53, %v970_v59  ;;  %v4205_v6 = vadd.f32 %v973_v11, %v3991_v34  ;;  %v4207_v41 = vpop.permute.xlu1 %1778  ;;  %v4209_v28 = vpop.permute.xlu0 %1774  ;;  %v2927_v24 = vld [vmem:[%s3972_s23 + $0x2] sm:$0x3]  ;;  %v2992_v59 = vld [vmem:[%s3972_s23 + $0x4] sm:$0x3] }
 0x160   : > { %4766 = vst [vmem:[#allocation58_spill] sm:$0xff] %v4197_v45  ;;  %4770 = vst [vmem:[#allocation62_spill] sm:$0xff] %v4207_v41 }
 0x161   : > { %4768 = vst [vmem:[#allocation60_spill] sm:$0xff] %v4202_v2  ;;  %4769 = vst [vmem:[#allocation61_spill] sm:$0xff] %v4205_v6 }
 0x162   : > { %4771 = vst [vmem:[#allocation63_spill] sm:$0xff] %v4209_v28  ;;  %v4211_v35 = vpop.f32.mrb[28].mxu0  ;;  %v977_v32 = vpop.f32.mrb[28].mxu1 }
 0x163   : > { %4772 = vst [vmem:[#allocation64_spill] sm:$0xff] %v4211_v35  ;;  %v4213_v23 = vpop.permute.xlu1 %1786  ;;  %v978_v15 = vadd.f32 %v977_v32, %v3988_v31  ;;  %v4216_v45 = vpop.permute.xlu0 %1782 }
 0x164   : > { %4773 = vst [vmem:[#allocation65_spill] sm:$0xff] %v4213_v23  ;;  %4774 = vst [vmem:[#allocation66_spill] sm:$0xff] %v4216_v45  ;;  %v4219_v61 = vpop.f32.mrb[29].mxu0  ;;  %v979_v53 = vpop.f32.mrb[29].mxu1  ;;  %v4234_v45 = vrot.slane %v2927_v24, %v3976_v3 }
 0x165   : > { %4775 = vst [vmem:[#allocation67_spill] sm:$0xff] %v4219_v61  ;;  %v4223_v11 = vmul.f32 %v3978_v8, %v978_v15  ;;  %v980_v2 = vadd.f32 %v979_v53, %v3991_v34  ;;  %v4226_v6 = vpop.f32.mrb[30].mxu0  ;;  %v981_v41 = vpop.f32.mrb[30].mxu1  ;;  %v828_v61 = vadd.f32 %v3997_v55, %v3988_v31  ;;  %v4256_v55 = vrot.slane %v2927_v24, %v3983_v25 }
 0x166   : > { %4777 = vst [vmem:[#allocation69_spill] sm:$0xff] %v4226_v6  ;;  %v4229_v28 = vadd.f32 %v981_v41, %v3988_v31  ;;  %v4231_v23 = vpop.f32.mrb[31].mxu0  ;;  %v983_v32 = vpop.f32.mrb[31].mxu1  ;;  %v4249_v41 = vrot.slane %v2992_v59, %v3976_v3 }
 0x167   : > { %4776 = vst [vmem:[#allocation68_spill] sm:$0xff] %v4223_v11  ;;  %4779 = vst [vmem:[#allocation71_spill] sm:$0xff] %v4231_v23  ;;  %v4239_v15 = vmul.f32 %v3978_v8, %v980_v2  ;;  %v4242_v53 = vadd.f32 %v983_v32, %v3991_v34  ;;  %v4244_v11 = vpop.permute.xlu1 %1794  ;;  %v4246_v6 = vpop.permute.xlu0 %1790  ;;  %v832_v23 = vadd.f32 %v4003_v58, %v3988_v31 }
 0x168   : > { %4778 = vst [vmem:[#allocation70_spill] sm:$0xff] %v4229_v28  ;;  %4782 = vst [vmem:[#allocation74_spill] sm:$0xff] %v4244_v11  ;;  %v830_v28 = vadd.f32 %v4000_v21, %v3991_v34  ;;  %v4259_v8 = vrot.slane %v2992_v59, %v3983_v25  ;;  %v834_v2 = vadd.f32 %v4009_v12, %v3991_v34 }
 0x169   : > { %4780 = vst [vmem:[#allocation72_spill] sm:$0xff] %v4239_v15  ;;  %4781 = vst [vmem:[#allocation73_spill] sm:$0xff] %v4242_v53  ;;  %v1146_v3 = vmul.f32 %v3841_v10, %v828_v61  ;;  %v838_v25 = vadd.f32 %v4025_v49, %v3988_v31  ;;  %v840_v12 = vadd.f32 %v4028_v57, %v3991_v34 }
 0x16a   : > { %4783 = vst [vmem:[#allocation75_spill] sm:$0xff] %v4246_v6  ;;  %v1514_v32 = vpop.f32.mrb[32].mxu1  ;;  %v2169_v15 = vpop.f32.mrb[32].mxu0  ;;  %v1147_v24 = vmul.f32 %v3841_v10, %v830_v28  ;;  %v1148_v6 = vmul.f32 %v3849_v27, %v832_v23  ;;  %v1149_v28 = vmul.f32 %v3849_v27, %v834_v2  ;;  %v842_v49 = vadd.f32 %v4031_v0, %v3988_v31 }
 0x16b   : > { %v2330_v53 = vpop.permute.xlu1 %2329  ;;  %v1515_v21 = vadd.f32 %v1514_v32, %v4234_v45  ;;  %v2170_v11 = vadd.f32 %v2169_v15, %v4249_v41  ;;  %v4266_v58 = vpop.permute.xlu0 %1798  ;;  %v1150_v27 = vmul.f32 %v3831_v60, %v838_v25 }
 0x16c   : > { %4784 = vst [vmem:[#allocation76_spill] sm:$0xff] %v4266_v58  ;;  %v1516_v59 = vpop.f32.mrb[33].mxu1  ;;  %v2171_v35 = vpop.f32.mrb[33].mxu0 }
 0x16d   : > { %v1801_v61 = vmul.f32 %v3995_v50, %v1515_v21  ;;  %v2456_v32 = vmul.f32 %v2330_v53, %v2170_v11  ;;  %v1517_v15 = vadd.f32 %v1516_v59, %v4256_v55  ;;  %v2172_v58 = vadd.f32 %v2171_v35, %v4259_v8  ;;  %v1518_v22 = vpop.f32.mrb[34].mxu1  ;;  %v2173_v10 = vpop.f32.mrb[34].mxu0 }
 0x16e   : > { %v1519_v23 = vadd.f32 %v1518_v22, %v4234_v45  ;;  %v2174_v57 = vadd.f32 %v2173_v10, %v4249_v41  ;;  %v1520_v20 = vpop.f32.mrb[35].mxu1  ;;  %v2175_v63 = vpop.f32.mrb[35].mxu0  ;;  %v844_v22 = vadd.f32 %v4037_v18, %v3991_v34 }
 0x16f   : > { %v1865_v36 = vadd.f32 %v1801_v61, %v1146_v3  ;;  %v1802_v11 = vmul.f32 %v3995_v50, %v1517_v15  ;;  %v2457_v21 = vmul.f32 %v2330_v53, %v2172_v58  ;;  %v1521_v59 = vadd.f32 %v1520_v20, %v4256_v55  ;;  %v2334_v35 = vpop.permute.xlu0 %2333  ;;  %v2338_v58 = vpop.permute.xlu1 %2337 }
 0x170   : > { %v1803_v0 = vmul.f32 %v3980_v13, %v1519_v23  ;;  %v2176_v2 = vadd.f32 %v2175_v63, %v4259_v8  ;;  %v1151_v50 = vmul.f32 %v3831_v60, %v840_v12  ;;  %v1152_v61 = vmul.f32 %v3839_v4, %v842_v49 }
 0x171   : > { %v2520_v53 = vadd.f32 %v2456_v32, %v1865_v36  ;;  %v1866_v20 = vadd.f32 %v1802_v11, %v1147_v24  ;;  %v1804_v3 = vmul.f32 %v3980_v13, %v1521_v59  ;;  %v2458_v10 = vmul.f32 %v2334_v35, %v2174_v57 }
 0x172   : > { %v1867_v15 = vadd.f32 %v1803_v0, %v1148_v6  ;;  %v2459_v25 = vmul.f32 %v2334_v35, %v2176_v2  ;;  %v1524_v9 = vpop.f32.mrb[36].mxu1  ;;  %v2179_v30 = vpop.f32.mrb[36].mxu0  ;;  %v1153_v13 = vmul.f32 %v3839_v4, %v844_v22  ;;  %v848_v24 = vadd.f32 %v4055_v39, %v3988_v31 }
 0x173   : > { %2584 = vst [vmem:[%s4288_s26] sm:$0xff] %v2520_v53  ;;  %v2521_v18 = vadd.f32 %v2457_v21, %v1866_v20  ;;  %v1868_v23 = vadd.f32 %v1804_v3, %v1149_v28  ;;  %v1525_v63 = vadd.f32 %v1524_v9, %v4234_v45  ;;  %v2180_v60 = vadd.f32 %v2179_v30, %v4249_v41  ;;  %v1526_v36 = vpop.f32.mrb[37].mxu1  ;;  %v2181_v32 = vpop.f32.mrb[37].mxu0 }
 0x174   : > { %v2522_v6 = vadd.f32 %v2458_v10, %v1867_v15  ;;  %v1527_v12 = vadd.f32 %v1526_v36, %v4256_v55  ;;  %v1528_v49 = vpop.f32.mrb[38].mxu1  ;;  %v2182_v11 = vadd.f32 %v2181_v32, %v4259_v8  ;;  %v2183_v30 = vpop.f32.mrb[38].mxu0  ;;  %v850_v0 = vadd.f32 %v4060_v44, %v3991_v34 }
 0x175   : > { %2585 = vst [vmem:[%s4288_s26 + $0x8] sm:$0xff] %v2521_v18  ;;  %v2523_v57 = vadd.f32 %v2459_v25, %v1868_v23  ;;  %v1805_v28 = vmul.f32 %v3993_v37, %v1525_v63  ;;  %v2460_v9 = vmul.f32 %v2338_v58, %v2180_v60  ;;  %v1530_v21 = vpop.f32.mrb[39].mxu1  ;;  %v1529_v39 = vadd.f32 %v1528_v49, %v4234_v45  ;;  %v2185_v22 = vpop.f32.mrb[39].mxu0 }
 0x176   : > { %2586 = vst [vmem:[%s4288_s26 + $0x10] sm:$0xff] %v2522_v6  ;;  %v1806_v4 = vmul.f32 %v3993_v37, %v1527_v12  ;;  %v2184_v59 = vadd.f32 %v2183_v30, %v4249_v41  ;;  %v1531_v35 = vadd.f32 %v1530_v21, %v4256_v55  ;;  %v2461_v53 = vmul.f32 %v2338_v58, %v2182_v11  ;;  %v2342_v15 = vpop.permute.xlu1 %2341  ;;  %v2346_v63 = vpop.permute.xlu0 %2345 }
 0x177   : > { %2587 = vst [vmem:[%s4288_s26 + $0x18] sm:$0xff] %v2523_v57  ;;  %v1869_v2 = vadd.f32 %v1805_v28, %v1150_v27  ;;  %v2186_v20 = vadd.f32 %v2185_v22, %v4259_v8  ;;  %v852_v3 = vadd.f32 %v4063_v43, %v3988_v31  ;;  %v1807_v10 = vmul.f32 %v4023_v52, %v1529_v39 }
 0x178   : > { %v1870_v37 = vadd.f32 %v1806_v4, %v1151_v50  ;;  %v1808_v25 = vmul.f32 %v4023_v52, %v1531_v35  ;;  %v1154_v18 = vmul.f32 %v3859_v40, %v848_v24  ;;  %v2462_v44 = vmul.f32 %v2342_v15, %v2184_v59 }
 0x179   : > { %v2524_v23 = vadd.f32 %v2460_v9, %v1869_v2  ;;  %v1871_v58 = vadd.f32 %v1807_v10, %v1152_v61  ;;  %v2463_v36 = vmul.f32 %v2342_v15, %v2186_v20  ;;  %v1155_v43 = vmul.f32 %v3859_v40, %v850_v0 }
 0x17a   : > { %v2525_v27 = vadd.f32 %v2461_v53, %v1870_v37  ;;  %v1872_v60 = vadd.f32 %v1808_v25, %v1153_v13  ;;  %v1534_v6 = vpop.f32.mrb[40].mxu1  ;;  %v2189_v12 = vpop.f32.mrb[40].mxu0  ;;  %v854_v50 = vadd.f32 %v4069_v51, %v3991_v34  ;;  %v1156_v49 = vmul.f32 %v3847_v19, %v852_v3 }
 0x17b   : > { %2588 = vst [vmem:[%s4288_s26 + $0x20] sm:$0xff] %v2524_v23  ;;  %v1535_v52 = vadd.f32 %v1534_v6, %v4234_v45  ;;  %v2190_v24 = vadd.f32 %v2189_v12, %v4249_v41  ;;  %v1536_v32 = vpop.f32.mrb[41].mxu1  ;;  %v2526_v61 = vadd.f32 %v2462_v44, %v1871_v58  ;;  %v2191_v28 = vpop.f32.mrb[41].mxu0  ;;  %v858_v39 = vadd.f32 %v4085_v38, %v3988_v31 }
 0x17c   : > { %2589 = vst [vmem:[%s4288_s26 + $0x28] sm:$0xff] %v2525_v27  ;;  %v2527_v13 = vadd.f32 %v2463_v36, %v1872_v60  ;;  %v1537_v57 = vadd.f32 %v1536_v32, %v4256_v55  ;;  %v1538_v40 = vpop.f32.mrb[42].mxu1  ;;  %v2192_v51 = vadd.f32 %v2191_v28, %v4259_v8  ;;  %v2193_v30 = vpop.f32.mrb[42].mxu0  ;;  %v1157_v15 = vmul.f32 %v3847_v19, %v854_v50 }
 0x17d   : > { %v1809_v9 = vmul.f32 %v4021_v42, %v1535_v52  ;;  %v1539_v11 = vadd.f32 %v1538_v40, %v4234_v45  ;;  %v1540_v21 = vpop.f32.mrb[43].mxu1  ;;  %v2464_v4 = vmul.f32 %v2346_v63, %v2190_v24  ;;  %2590 = vst [vmem:[%s4288_s26 + $0x30] sm:$0xff] %v2526_v61  ;;  %v2194_v35 = vadd.f32 %v2193_v30, %v4249_v41  ;;  %v2195_v0 = vpop.f32.mrb[43].mxu0 }
 0x17e   : > { %2591 = vst [vmem:[%s4288_s26 + $0x38] sm:$0xff] %v2527_v13  ;;  %v1810_v59 = vmul.f32 %v4021_v42, %v1537_v57  ;;  %v1541_v22 = vadd.f32 %v1540_v21, %v4256_v55  ;;  %v2196_v20 = vadd.f32 %v2195_v0, %v4259_v8  ;;  %v2465_v3 = vmul.f32 %v2346_v63, %v2192_v51  ;;  %v2350_v37 = vpop.permute.xlu1 %2349  ;;  %v2354_v6 = vpop.permute.xlu0 %2353 }
 0x17f   : > { %v1873_v2 = vadd.f32 %v1809_v9, %v1154_v18  ;;  %v1811_v53 = vmul.f32 %v4045_v17, %v1539_v11  ;;  %v860_v38 = vadd.f32 %v4092_v14, %v3991_v34  ;;  %v2466_v23 = vmul.f32 %v2350_v37, %v2194_v35 }
 0x180   : > { %v1874_v10 = vadd.f32 %v1810_v59, %v1155_v43  ;;  %v1812_v42 = vmul.f32 %v4045_v17, %v1541_v22  ;;  %v862_v18 = vadd.f32 %v4098_v33, %v3988_v31  ;;  %v2467_v58 = vmul.f32 %v2350_v37, %v2196_v20 }
 0x181   : > { %v1875_v25 = vadd.f32 %v1811_v53, %v1156_v49  ;;  %v2528_v44 = vadd.f32 %v2464_v4, %v1873_v2  ;;  %v1158_v36 = vmul.f32 %v3871_v54, %v858_v39  ;;  %v1159_v33 = vmul.f32 %v3871_v54, %v860_v38 }
 0x182   : > { %v1876_v27 = vadd.f32 %v1812_v42, %v1157_v15  ;;  %v2529_v63 = vadd.f32 %v2465_v3, %v1874_v10  ;;  %v1544_v60 = vpop.f32.mrb[44].mxu1  ;;  %v2199_v19 = vpop.f32.mrb[44].mxu0  ;;  %v864_v50 = vadd.f32 %v4101_v46, %v3991_v34  ;;  %v1160_v54 = vmul.f32 %v3857_v16, %v862_v18 }
 0x183   : > { %v2530_v14 = vadd.f32 %v2466_v23, %v1875_v25  ;;  %2592 = vst [vmem:[%s4288_s26 + $0x40] sm:$0xff] %v2528_v44  ;;  %v1545_v17 = vadd.f32 %v1544_v60, %v4234_v45  ;;  %v2200_v12 = vadd.f32 %v2199_v19, %v4249_v41  ;;  %v1546_v43 = vpop.f32.mrb[45].mxu1  ;;  %v2201_v32 = vpop.f32.mrb[45].mxu0  ;;  %v868_v22 = vadd.f32 %v4117_v62, %v3988_v31 }
 0x184   : > { %v2531_v52 = vadd.f32 %v2467_v58, %v1876_v27  ;;  %2593 = vst [vmem:[%s4288_s26 + $0x48] sm:$0xff] %v2529_v63  ;;  %v1547_v24 = vadd.f32 %v1546_v43, %v4256_v55  ;;  %v1548_v49 = vpop.f32.mrb[46].mxu1  ;;  %v2202_v57 = vadd.f32 %v2201_v32, %v4259_v8  ;;  %v2203_v40 = vpop.f32.mrb[46].mxu0  ;;  %v1161_v35 = vmul.f32 %v3857_v16, %v864_v50 }
 0x185   : > { %2594 = vst [vmem:[%s4288_s26 + $0x50] sm:$0xff] %v2530_v14  ;;  %v1813_v61 = vmul.f32 %v4043_v1, %v1545_v17  ;;  %v2468_v13 = vmul.f32 %v2354_v6, %v2200_v12  ;;  %v1549_v28 = vadd.f32 %v1548_v49, %v4234_v45  ;;  %v1550_v9 = vpop.f32.mrb[47].mxu1  ;;  %v2204_v51 = vadd.f32 %v2203_v40, %v4249_v41  ;;  %v2205_v30 = vpop.f32.mrb[47].mxu0 }
 0x186   : > { %2595 = vst [vmem:[%s4288_s26 + $0x58] sm:$0xff] %v2531_v52  ;;  %v1814_v46 = vmul.f32 %v4043_v1, %v1547_v24  ;;  %v1551_v11 = vadd.f32 %v1550_v9, %v4256_v55  ;;  %v2469_v4 = vmul.f32 %v2354_v6, %v2202_v57  ;;  %v2206_v59 = vadd.f32 %v2205_v30, %v4259_v8  ;;  %v2358_v0 = vpop.permute.xlu1 %2357  ;;  %v2362_v25 = vpop.permute.xlu0 %2361 }
 0x187   : > { %v1877_v21 = vadd.f32 %v1813_v61, %v1158_v36  ;;  %v1815_v39 = vmul.f32 %v4057_v48, %v1549_v28  ;;  %v2470_v3 = vmul.f32 %v2358_v0, %v2204_v51  ;;  %v870_v15 = vadd.f32 %v4124_v26, %v3991_v34  ;;  %v4785_v61 = vld [vmem:[#allocation40_spill] sm:$0xff]  ;;  %v4787_v51 = vld [vmem:[#allocation43_spill] sm:$0xff] }
 0x188   : > { %v1878_v2 = vadd.f32 %v1814_v46, %v1159_v33  ;;  %v1816_v1 = vmul.f32 %v4057_v48, %v1551_v11  ;;  %v2471_v10 = vmul.f32 %v2358_v0, %v2206_v59  ;;  %v1162_v48 = vmul.f32 %v3881_v5, %v868_v22 }
 0x189   : > { %v2532_v53 = vadd.f32 %v2468_v13, %v1877_v21  ;;  %v1879_v20 = vadd.f32 %v1815_v39, %v1160_v54  ;;  %v872_v44 = vadd.f32 %v4130_v7, %v3988_v31  ;;  %v874_v63 = vadd.f32 %v4133_v29, %v3991_v34  ;;  %v4786_v13 = vld [vmem:[#allocation21_spill] sm:$0xff] }
 0x18a   : > { %v2533_v38 = vadd.f32 %v2469_v4, %v1878_v2  ;;  %v1880_v37 = vadd.f32 %v1816_v1, %v1161_v35  ;;  %v1554_v42 = vpop.f32.mrb[48].mxu1  ;;  %v2209_v23 = vpop.f32.mrb[48].mxu0  ;;  %v1163_v7 = vmul.f32 %v3881_v5, %v870_v15  ;;  %v878_v5 = vadd.f32 %v4785_v61, %v3988_v31  ;;  %v4788_v1 = vld [vmem:[#allocation6_spill] sm:$0xff] }
 0x18b   : > { %2596 = vst [vmem:[%s4288_s26 + $0x60] sm:$0xff] %v2532_v53  ;;  %v2534_v16 = vadd.f32 %v2470_v3, %v1879_v20  ;;  %v1555_v62 = vadd.f32 %v1554_v42, %v4234_v45  ;;  %v2210_v26 = vadd.f32 %v2209_v23, %v4249_v41  ;;  %v1556_v27 = vpop.f32.mrb[49].mxu1  ;;  %v2211_v58 = vpop.f32.mrb[49].mxu0  ;;  %v1164_v49 = vmul.f32 %v3869_v47, %v872_v44  ;;  %v4789_v20 = vld [vmem:[#allocation45_spill] sm:$0xff]  ;;  %v4790_v15 = vld [vmem:[#allocation46_spill] sm:$0xff] }
 0x18c   : > { %2597 = vst [vmem:[%s4288_s26 + $0x68] sm:$0xff] %v2533_v38  ;;  %v2535_v18 = vadd.f32 %v2471_v10, %v1880_v37  ;;  %v1557_v19 = vadd.f32 %v1556_v27, %v4256_v55  ;;  %v2212_v36 = vadd.f32 %v2211_v58, %v4259_v8  ;;  %v1558_v14 = vpop.f32.mrb[50].mxu1  ;;  %v2213_v6 = vpop.f32.mrb[50].mxu0  ;;  %v1165_v40 = vmul.f32 %v3869_v47, %v874_v63 }
 0x18d   : > { %2598 = vst [vmem:[%s4288_s26 + $0x70] sm:$0xff] %v2534_v16  ;;  %v1817_v60 = vmul.f32 %v4053_v56, %v1555_v62  ;;  %v2472_v17 = vmul.f32 %v2362_v25, %v2210_v26  ;;  %v1559_v12 = vadd.f32 %v1558_v14, %v4234_v45  ;;  %v2214_v43 = vadd.f32 %v2213_v6, %v4249_v41  ;;  %v1560_v33 = vpop.f32.mrb[51].mxu1  ;;  %v2215_v50 = vpop.f32.mrb[51].mxu0 }
 0x18e   : > { %2599 = vst [vmem:[%s4288_s26 + $0x78] sm:$0xff] %v2535_v18  ;;  %v1818_v52 = vmul.f32 %v4053_v56, %v1557_v19  ;;  %v2473_v24 = vmul.f32 %v2362_v25, %v2212_v36  ;;  %v1561_v32 = vadd.f32 %v1560_v33, %v4256_v55  ;;  %v2216_v28 = vadd.f32 %v2215_v50, %v4259_v8  ;;  %v2366_v9 = vpop.permute.xlu1 %2365  ;;  %v2370_v35 = vpop.permute.xlu0 %2369  ;;  %v4791_v25 = vld [vmem:[#allocation20_spill] sm:$0xff] }
 0x18f   : > { %v1881_v29 = vadd.f32 %v1817_v60, %v1162_v48  ;;  %v1819_v57 = vmul.f32 %v4786_v13, %v1559_v12  ;;  %v880_v11 = vadd.f32 %v4787_v51, %v3991_v34  ;;  %v2474_v21 = vmul.f32 %v2366_v9, %v2214_v43  ;;  %v4793_v43 = vld [vmem:[#allocation52_spill] sm:$0xff] }
 0x190   : > { %v1882_v46 = vadd.f32 %v1818_v52, %v1163_v7  ;;  %v1820_v56 = vmul.f32 %v4786_v13, %v1561_v32  ;;  %v2475_v4 = vmul.f32 %v2366_v9, %v2216_v28  ;;  %v1166_v53 = vmul.f32 %v4788_v1, %v878_v5  ;;  %v4795_v13 = vld [vmem:[#allocation55_spill] sm:$0xff] }
 0x191   : > { %v2536_v54 = vadd.f32 %v2472_v17, %v1881_v29  ;;  %v1883_v30 = vadd.f32 %v1819_v57, %v1164_v49  ;;  %v882_v3 = vadd.f32 %v4789_v20, %v3988_v31  ;;  %v884_v38 = vadd.f32 %v4790_v15, %v3991_v34  ;;  %v4792_v17 = vld [vmem:[#allocation4_spill] sm:$0xff]  ;;  %v4794_v29 = vld [vmem:[#allocation25_spill] sm:$0xff] }
 0x192   : > { %v1564_v39 = vpop.f32.mrb[52].mxu1  ;;  %v2219_v59 = vpop.f32.mrb[52].mxu0  ;;  %v2537_v22 = vadd.f32 %v2473_v24, %v1882_v46  ;;  %v1884_v0 = vadd.f32 %v1820_v56, %v1165_v40  ;;  %v1167_v26 = vmul.f32 %v4788_v1, %v880_v11  ;;  %v888_v33 = vadd.f32 %v4793_v43, %v3988_v31  ;;  %v4799_v20 = vld [vmem:[#allocation24_spill] sm:$0xff] }
 0x193   : > { %2600 = vst [vmem:[%s4288_s26 + $0x80] sm:$0xff] %v2536_v54  ;;  %v1565_v47 = vadd.f32 %v1564_v39, %v4234_v45  ;;  %v2220_v2 = vadd.f32 %v2219_v59, %v4249_v41  ;;  %v2538_v37 = vadd.f32 %v2474_v21, %v1883_v30  ;;  %v1566_v10 = vpop.f32.mrb[53].mxu1  ;;  %v2221_v42 = vpop.f32.mrb[53].mxu0  ;;  %v1168_v12 = vmul.f32 %v4792_v17, %v882_v3  ;;  %v4797_v59 = vld [vmem:[#allocation57_spill] sm:$0xff] }
 0x194   : > { %2601 = vst [vmem:[%s4288_s26 + $0x88] sm:$0xff] %v2537_v22  ;;  %v2539_v16 = vadd.f32 %v2475_v4, %v1884_v0  ;;  %v1567_v48 = vadd.f32 %v1566_v10, %v4256_v55  ;;  %v1568_v44 = vpop.f32.mrb[54].mxu1  ;;  %v2223_v18 = vpop.f32.mrb[54].mxu0  ;;  %v2222_v27 = vadd.f32 %v2221_v42, %v4259_v8  ;;  %v1169_v24 = vmul.f32 %v4792_v17, %v884_v38  ;;  %v4796_v4 = vld [vmem:[#allocation8_spill] sm:$0xff]  ;;  %v4798_v22 = vld [vmem:[#allocation59_spill] sm:$0xff] }
 0x195   : > { %v1821_v62 = vmul.f32 %v4791_v25, %v1565_v47  ;;  %v2476_v23 = vmul.f32 %v2370_v35, %v2220_v2  ;;  %2602 = vst [vmem:[%s4288_s26 + $0x90] sm:$0xff] %v2538_v37  ;;  %v1569_v58 = vadd.f32 %v1568_v44, %v4234_v45  ;;  %v2224_v63 = vadd.f32 %v2223_v18, %v4249_v41  ;;  %v1570_v60 = vpop.f32.mrb[55].mxu1  ;;  %v2225_v19 = vpop.f32.mrb[55].mxu0 }
 0x196   : > { %2603 = vst [vmem:[%s4288_s26 + $0x98] sm:$0xff] %v2539_v16  ;;  %v1822_v14 = vmul.f32 %v4791_v25, %v1567_v48  ;;  %v1571_v6 = vadd.f32 %v1570_v60, %v4256_v55  ;;  %v2226_v7 = vadd.f32 %v2225_v19, %v4259_v8  ;;  %v2477_v50 = vmul.f32 %v2370_v35, %v2222_v27  ;;  %v2374_v32 = vpop.permute.xlu1 %2373  ;;  %v2378_v56 = vpop.permute.xlu0 %2377  ;;  %v4801_v60 = vld [vmem:[#allocation64_spill] sm:$0xff] }
 0x197   : > { %v1885_v36 = vadd.f32 %v1821_v62, %v1166_v53  ;;  %v1823_v52 = vmul.f32 %v4794_v29, %v1569_v58  ;;  %v890_v57 = vadd.f32 %v4795_v13, %v3991_v34  ;;  %v2478_v40 = vmul.f32 %v2374_v32, %v2224_v63  ;;  %v4800_v58 = vld [vmem:[#allocation5_spill] sm:$0xff] }
 0x198   : > { %v1886_v61 = vadd.f32 %v1822_v14, %v1167_v26  ;;  %v1824_v5 = vmul.f32 %v4794_v29, %v1571_v6  ;;  %v2479_v9 = vmul.f32 %v2374_v32, %v2226_v7  ;;  %v1170_v39 = vmul.f32 %v4796_v4, %v888_v33  ;;  %v4802_v14 = vld [vmem:[#allocation29_spill] sm:$0xff] }
 0x199   : > { %v2540_v49 = vadd.f32 %v2476_v23, %v1885_v36  ;;  %v1887_v28 = vadd.f32 %v1823_v52, %v1168_v12  ;;  %v892_v35 = vadd.f32 %v4797_v59, %v3988_v31  ;;  %v894_v0 = vadd.f32 %v4798_v22, %v3991_v34  ;;  %v4807_v59 = vld [vmem:[#allocation28_spill] sm:$0xff] }
 0x19a   : > { %v1574_v54 = vpop.f32.mrb[56].mxu1  ;;  %v2229_v46 = vpop.f32.mrb[56].mxu0  ;;  %v2541_v51 = vadd.f32 %v2477_v50, %v1886_v61  ;;  %v1888_v11 = vadd.f32 %v1824_v5, %v1169_v24  ;;  %v1171_v42 = vmul.f32 %v4796_v4, %v890_v57  ;;  %v898_v19 = vadd.f32 %v4801_v60, %v3988_v31  ;;  %v4803_v50 = vld [vmem:[#allocation67_spill] sm:$0xff] }
 0x19b   : > { %2604 = vst [vmem:[%s4288_s26 + $0xa0] sm:$0xff] %v2540_v49  ;;  %v1575_v30 = vadd.f32 %v1574_v54, %v4234_v45  ;;  %v2230_v21 = vadd.f32 %v2229_v46, %v4249_v41  ;;  %v2542_v47 = vadd.f32 %v2478_v40, %v1887_v28  ;;  %v1576_v2 = vpop.f32.mrb[57].mxu1  ;;  %v2231_v1 = vpop.f32.mrb[57].mxu0  ;;  %v1172_v63 = vmul.f32 %v4800_v58, %v892_v35  ;;  %v4805_v46 = vld [vmem:[#allocation69_spill] sm:$0xff] }
 0x19c   : > { %2605 = vst [vmem:[%s4288_s26 + $0xa8] sm:$0xff] %v2541_v51  ;;  %v2543_v53 = vadd.f32 %v2479_v9, %v1888_v11  ;;  %v1577_v38 = vadd.f32 %v1576_v2, %v4256_v55  ;;  %v1578_v37 = vpop.f32.mrb[58].mxu1  ;;  %v2233_v10 = vpop.f32.mrb[58].mxu0  ;;  %v2232_v16 = vadd.f32 %v2231_v1, %v4259_v8  ;;  %v1173_v7 = vmul.f32 %v4800_v58, %v894_v0  ;;  %v4804_v9 = vld [vmem:[#allocation9_spill] sm:$0xff]  ;;  %v4806_v51 = vld [vmem:[#allocation71_spill] sm:$0xff] }
 0x19d   : > { %v1825_v3 = vmul.f32 %v4799_v20, %v1575_v30  ;;  %v2480_v15 = vmul.f32 %v2378_v56, %v2230_v21  ;;  %2606 = vst [vmem:[%s4288_s26 + $0xb0] sm:$0xff] %v2542_v47  ;;  %v1579_v25 = vadd.f32 %v1578_v37, %v4234_v45  ;;  %v2234_v62 = vadd.f32 %v2233_v10, %v4249_v41  ;;  %v1580_v23 = vpop.f32.mrb[59].mxu1  ;;  %v2235_v48 = vpop.f32.mrb[59].mxu0 }
 0x19e   : > { %2607 = vst [vmem:[%s4288_s26 + $0xb8] sm:$0xff] %v2543_v53  ;;  %v1826_v18 = vmul.f32 %v4799_v20, %v1577_v38  ;;  %v1581_v26 = vadd.f32 %v1580_v23, %v4256_v55  ;;  %v2236_v27 = vadd.f32 %v2235_v48, %v4259_v8  ;;  %v2481_v36 = vmul.f32 %v2378_v56, %v2232_v16  ;;  %v2382_v17 = vpop.permute.xlu1 %2381  ;;  %v2386_v5 = vpop.permute.xlu0 %2385 }
 0x19f   : > { %v1889_v44 = vadd.f32 %v1825_v3, %v1170_v39  ;;  %v1827_v6 = vmul.f32 %v4802_v14, %v1579_v25  ;;  %v900_v29 = vadd.f32 %v4803_v50, %v3991_v34  ;;  %v2482_v24 = vmul.f32 %v2382_v17, %v2234_v62  ;;  %v4809_v62 = vld [vmem:[#allocation33_spill] sm:$0xff] }
 0x1a0   : > { %v1890_v43 = vadd.f32 %v1826_v18, %v1171_v42  ;;  %v1828_v33 = vmul.f32 %v4802_v14, %v1581_v26  ;;  %v2483_v32 = vmul.f32 %v2382_v17, %v2236_v27  ;;  %v1174_v54 = vmul.f32 %v4804_v9, %v898_v19  ;;  %v4808_v42 = vld [vmem:[#allocation7_spill] sm:$0xff] }
 0x1a1   : > { %v2544_v12 = vadd.f32 %v2480_v15, %v1889_v44  ;;  %v1891_v52 = vadd.f32 %v1827_v6, %v1172_v63  ;;  %v902_v56 = vadd.f32 %v4805_v46, %v3988_v31  ;;  %v904_v11 = vadd.f32 %v4806_v51, %v3991_v34 }
 0x1a2   : > { %v1584_v49 = vpop.f32.mrb[60].mxu1  ;;  %v2239_v61 = vpop.f32.mrb[60].mxu0  ;;  %v2545_v13 = vadd.f32 %v2481_v36, %v1890_v43  ;;  %v1892_v57 = vadd.f32 %v1828_v33, %v1173_v7  ;;  %v1175_v1 = vmul.f32 %v4804_v9, %v900_v29 }
 0x1a3   : > { %2608 = vst [vmem:[%s4288_s26 + $0xc0] sm:$0xff] %v2544_v12  ;;  %v1585_v28 = vadd.f32 %v1584_v49, %v4234_v45  ;;  %v2240_v40 = vadd.f32 %v2239_v61, %v4249_v41  ;;  %v2546_v30 = vadd.f32 %v2482_v24, %v1891_v52  ;;  %v1586_v21 = vpop.f32.mrb[61].mxu1  ;;  %v2241_v4 = vpop.f32.mrb[61].mxu0  ;;  %v1176_v16 = vmul.f32 %v4808_v42, %v902_v56  ;;  %v4810_v52 = vld [vmem:[#allocation32_spill] sm:$0xff] }
 0x1a4   : > { %2609 = vst [vmem:[%s4288_s26 + $0xc8] sm:$0xff] %v2545_v13  ;;  %v2547_v39 = vadd.f32 %v2483_v32, %v1892_v57  ;;  %v1587_v0 = vadd.f32 %v1586_v21, %v4256_v55  ;;  %v1588_v47 = vpop.f32.mrb[62].mxu1  ;;  %v2243_v2 = vpop.f32.mrb[62].mxu0  ;;  %v2242_v31 = vadd.f32 %v2241_v4, %v4259_v8  ;;  %v1177_v48 = vmul.f32 %v4808_v42, %v904_v11  ;;  %v4812_v21 = vld [vmem:[#allocation37_spill] sm:$0xff] }
 0x1a5   : > { %v1829_v35 = vmul.f32 %v4807_v59, %v1585_v28  ;;  %v2484_v22 = vmul.f32 %v2386_v5, %v2240_v40  ;;  %2610 = vst [vmem:[%s4288_s26 + $0xd0] sm:$0xff] %v2546_v30  ;;  %v1589_v34 = vadd.f32 %v1588_v47, %v4234_v45  ;;  %v2244_v53 = vadd.f32 %v2243_v2, %v4249_v41  ;;  %v1590_v20 = vpop.f32.mrb[63].mxu1  ;;  %v2245_v3 = vpop.f32.mrb[63].mxu0  ;;  %v4814_v47 = vld [vmem:[#allocation12_spill] sm:$0xff] }
 0x1a6   : > { %2611 = vst [vmem:[%s4288_s26 + $0xd8] sm:$0xff] %v2547_v39  ;;  %v1830_v38 = vmul.f32 %v4807_v59, %v1587_v0  ;;  %v1591_v37 = vadd.f32 %v1590_v20, %v4256_v55  ;;  %v2246_v10 = vadd.f32 %v2245_v3, %v4259_v8  ;;  %v2485_v25 = vmul.f32 %v2386_v5, %v2242_v31  ;;  %v2390_v44 = vpop.permute.xlu1 %2389  ;;  %v2394_v14 = vpop.permute.xlu0 %2393  ;;  %v4815_v3 = vld [vmem:[#allocation13_spill] sm:$0xff] }
 0x1a7   : > { %v1893_v15 = vadd.f32 %v1829_v35, %v1174_v54  ;;  %v1831_v23 = vmul.f32 %v4809_v62, %v1589_v34  ;;  %v2486_v63 = vmul.f32 %v2390_v44, %v2244_v53  ;;  %v4811_v54 = vld [vmem:[#allocation10_spill] sm:$0xff]  ;;  %v4813_v35 = vld [vmem:[#allocation11_spill] sm:$0xff] }
 0x1a8   : > { %v1894_v26 = vadd.f32 %v1830_v38, %v1175_v1  ;;  %v1832_v27 = vmul.f32 %v4809_v62, %v1591_v37  ;;  %v2487_v60 = vmul.f32 %v2390_v44, %v2246_v10 }
 0x1a9   : > { %v2548_v18 = vadd.f32 %v2484_v22, %v1893_v15  ;;  %v1895_v58 = vadd.f32 %v1831_v23, %v1176_v16 }
 0x1aa   : > { %v1594_v19 = vpop.f32.mrb[64].mxu1  ;;  %v2249_v36 = vpop.f32.mrb[64].mxu0  ;;  %v2549_v6 = vadd.f32 %v2485_v25, %v1894_v26  ;;  %v1896_v7 = vadd.f32 %v1832_v27, %v1177_v48  ;;  %v4816_v48 = vld [vmem:[#allocation36_spill] sm:$0xff] }
 0x1ab   : > { %2612 = vst [vmem:[%s4288_s26 + $0xe0] sm:$0xff] %v2548_v18  ;;  %v1595_v17 = vadd.f32 %v1594_v19, %v4234_v45  ;;  %v2250_v12 = vadd.f32 %v2249_v36, %v4249_v41  ;;  %v2550_v43 = vadd.f32 %v2486_v63, %v1895_v58  ;;  %v1596_v33 = vpop.f32.mrb[65].mxu1  ;;  %v2251_v50 = vpop.f32.mrb[65].mxu0 }
 0x1ac   : > { %2613 = vst [vmem:[%s4288_s26 + $0xe8] sm:$0xff] %v2549_v6  ;;  %v2551_v29 = vadd.f32 %v2487_v60, %v1896_v7  ;;  %v1597_v49 = vadd.f32 %v1596_v33, %v4256_v55  ;;  %v1598_v61 = vpop.f32.mrb[66].mxu1  ;;  %v2253_v5 = vpop.f32.mrb[66].mxu0  ;;  %v2252_v13 = vadd.f32 %v2251_v50, %v4259_v8  ;;  %v4817_v6 = vld [vmem:[#allocation14_spill] sm:$0xff]  ;;  %v4818_v33 = vld [vmem:[#allocation15_spill] sm:$0xff] }
 0x1ad   : > { %v1833_v24 = vmul.f32 %v4810_v52, %v1595_v17  ;;  %v2488_v32 = vmul.f32 %v2394_v14, %v2250_v12  ;;  %2614 = vst [vmem:[%s4288_s26 + $0xf0] sm:$0xff] %v2550_v43  ;;  %v1599_v57 = vadd.f32 %v1598_v61, %v4234_v45  ;;  %v2254_v28 = vadd.f32 %v2253_v5, %v4249_v41  ;;  %v1600_v40 = vpop.f32.mrb[67].mxu1  ;;  %v2255_v9 = vpop.f32.mrb[67].mxu0 }
 0x1ae   : > { %2615 = vst [vmem:[%s4288_s26 + $0xf8] sm:$0xff] %v2551_v29  ;;  %v1834_v56 = vmul.f32 %v4810_v52, %v1597_v49  ;;  %v1601_v51 = vadd.f32 %v1600_v40, %v4256_v55  ;;  %v2256_v11 = vadd.f32 %v2255_v9, %v4259_v8  ;;  %v2489_v30 = vmul.f32 %v2394_v14, %v2252_v13  ;;  %v2398_v39 = vpop.permute.xlu1 %2397  ;;  %v2402_v58 = vpop.permute.xlu0 %2401  ;;  %v4819_v52 = vld [vmem:[#allocation42_spill] sm:$0xff]  ;;  %v4820_v13 = vld [vmem:[#allocation16_spill] sm:$0xff] }
 0x1af   : > { %v1897_v46 = vadd.f32 %v1833_v24, %v4811_v54  ;;  %v1835_v4 = vmul.f32 %v4812_v21, %v1599_v57  ;;  %v2490_v1 = vmul.f32 %v2398_v39, %v2254_v28  ;;  %v4821_v28 = vld [vmem:[#allocation17_spill] sm:$0xff] }
 0x1b0   : > { %v1898_v22 = vadd.f32 %v1834_v56, %v4813_v35  ;;  %v1836_v0 = vmul.f32 %v4812_v21, %v1601_v51  ;;  %v2491_v31 = vmul.f32 %v2398_v39, %v2256_v11 }
 0x1b1   : > { %v2552_v59 = vadd.f32 %v2488_v32, %v1897_v46  ;;  %v1899_v2 = vadd.f32 %v1835_v4, %v4814_v47 }
 0x1b2   : > { %v1604_v34 = vpop.f32.mrb[68].mxu1  ;;  %v2259_v53 = vpop.f32.mrb[68].mxu0  ;;  %v2553_v20 = vadd.f32 %v2489_v30, %v1898_v22  ;;  %v1900_v15 = vadd.f32 %v1836_v0, %v4815_v3  ;;  %v4822_v0 = vld [vmem:[#allocation41_spill] sm:$0xff] }
 0x1b3   : > { %2616 = vst [vmem:[%s4288_s26 + $0x100] sm:$0xff] %v2552_v59  ;;  %v1605_v38 = vadd.f32 %v1604_v34, %v4234_v45  ;;  %v2260_v37 = vadd.f32 %v2259_v53, %v4249_v41  ;;  %v1606_v10 = vpop.f32.mrb[69].mxu1  ;;  %v2554_v42 = vadd.f32 %v2490_v1, %v1899_v2  ;;  %v2261_v25 = vpop.f32.mrb[69].mxu0 }
 0x1b4   : > { %v1607_v16 = vadd.f32 %v1606_v10, %v4256_v55  ;;  %v1608_v62 = vpop.f32.mrb[70].mxu1  ;;  %2617 = vst [vmem:[%s4288_s26 + $0x108] sm:$0xff] %v2553_v20  ;;  %v2555_v23 = vadd.f32 %v2491_v31, %v1900_v15  ;;  %v2262_v18 = vadd.f32 %v2261_v25, %v4259_v8  ;;  %v2263_v26 = vpop.f32.mrb[70].mxu0 }
 0x1b5   : > { %v1837_v44 = vmul.f32 %v4816_v48, %v1605_v38  ;;  %v1610_v27 = vpop.f32.mrb[71].mxu1  ;;  %2618 = vst [vmem:[%s4288_s26 + $0x110] sm:$0xff] %v2554_v42  ;;  %v1609_v60 = vadd.f32 %v1608_v62, %v4234_v45  ;;  %v2264_v19 = vadd.f32 %v2263_v26, %v4249_v41  ;;  %v2265_v14 = vpop.f32.mrb[71].mxu0  ;;  %v2492_v17 = vmul.f32 %v2402_v58, %v2260_v37  ;;  %v4823_v38 = vld [vmem:[#allocation18_spill] sm:$0xff]  ;;  %v4824_v42 = vld [vmem:[#allocation49_spill] sm:$0xff]  ;;  %v4825_v62 = vld [vmem:[#allocation19_spill] sm:$0xff] }
 0x1b6   : > { %v1838_v63 = vmul.f32 %v4816_v48, %v1607_v16  ;;  %v1611_v36 = vadd.f32 %v1610_v27, %v4256_v55  ;;  %2619 = vst [vmem:[%s4288_s26 + $0x118] sm:$0xff] %v2555_v23  ;;  %v2266_v12 = vadd.f32 %v2265_v14, %v4259_v8  ;;  %v2406_v43 = vpop.permute.xlu1 %2405  ;;  %v2493_v29 = vmul.f32 %v2402_v58, %v2262_v18  ;;  %v2410_v53 = vpop.permute.xlu0 %2409  ;;  %v4826_v26 = vld [vmem:[#allocation22_spill] sm:$0xff] }
 0x1b7   : > { %v1901_v7 = vadd.f32 %v1837_v44, %v4817_v6  ;;  %v1839_v24 = vmul.f32 %v4819_v52, %v1609_v60  ;;  %v2494_v61 = vmul.f32 %v2406_v43, %v2264_v19  ;;  %v4827_v60 = vld [vmem:[#allocation23_spill] sm:$0xff] }
 0x1b8   : > { %v1902_v50 = vadd.f32 %v1838_v63, %v4818_v33  ;;  %v1840_v32 = vmul.f32 %v4819_v52, %v1611_v36  ;;  %v2495_v9 = vmul.f32 %v2406_v43, %v2266_v12 }
 0x1b9   : > { %v2556_v49 = vadd.f32 %v2492_v17, %v1901_v7  ;;  %v1903_v57 = vadd.f32 %v1839_v24, %v4820_v13 }
 0x1ba   : > { %v2557_v5 = vadd.f32 %v2493_v29, %v1902_v50  ;;  %v1904_v40 = vadd.f32 %v1840_v32, %v4821_v28  ;;  %v1614_v54 = vpop.f32.mrb[72].mxu1  ;;  %v2269_v46 = vpop.f32.mrb[72].mxu0 }
 0x1bb   : > { %2620 = vst [vmem:[%s4288_s26 + $0x120] sm:$0xff] %v2556_v49  ;;  %v1615_v56 = vadd.f32 %v1614_v54, %v4234_v45  ;;  %v2270_v51 = vadd.f32 %v2269_v46, %v4249_v41  ;;  %v1616_v11 = vpop.f32.mrb[73].mxu1  ;;  %v2271_v30 = vpop.f32.mrb[73].mxu0  ;;  %v2558_v21 = vadd.f32 %v2494_v61, %v1903_v57  ;;  %v4828_v49 = vld [vmem:[#allocation48_spill] sm:$0xff] }
 0x1bc   : > { %2621 = vst [vmem:[%s4288_s26 + $0x128] sm:$0xff] %v2557_v5  ;;  %v2559_v4 = vadd.f32 %v2495_v9, %v1904_v40  ;;  %v1617_v39 = vadd.f32 %v1616_v11, %v4256_v55  ;;  %v2272_v59 = vadd.f32 %v2271_v30, %v4259_v8  ;;  %v1618_v35 = vpop.f32.mrb[74].mxu1  ;;  %v2273_v22 = vpop.f32.mrb[74].mxu0  ;;  %v4830_v30 = vld [vmem:[#allocation54_spill] sm:$0xff] }
 0x1bd   : > { %v1841_v47 = vmul.f32 %v4822_v0, %v1615_v56  ;;  %v1619_v2 = vadd.f32 %v1618_v35, %v4234_v45  ;;  %v2274_v1 = vadd.f32 %v2273_v22, %v4249_v41  ;;  %v1620_v31 = vpop.f32.mrb[75].mxu1  ;;  %v2275_v34 = vpop.f32.mrb[75].mxu0  ;;  %2622 = vst [vmem:[%s4288_s26 + $0x130] sm:$0xff] %v2558_v21  ;;  %v2496_v10 = vmul.f32 %v2410_v53, %v2270_v51  ;;  %v4829_v56 = vld [vmem:[#allocation26_spill] sm:$0xff] }
 0x1be   : > { %2623 = vst [vmem:[%s4288_s26 + $0x138] sm:$0xff] %v2559_v4  ;;  %v1842_v20 = vmul.f32 %v4822_v0, %v1617_v39  ;;  %v1621_v3 = vadd.f32 %v1620_v31, %v4256_v55  ;;  %v2276_v15 = vadd.f32 %v2275_v34, %v4259_v8  ;;  %v2414_v25 = vpop.permute.xlu1 %2413  ;;  %v2497_v48 = vmul.f32 %v2410_v53, %v2272_v59  ;;  %v2418_v40 = vpop.permute.xlu0 %2417  ;;  %v4831_v39 = vld [vmem:[#allocation27_spill] sm:$0xff] }
 0x1bf   : > { %v1905_v37 = vadd.f32 %v1841_v47, %v4823_v38  ;;  %v1843_v16 = vmul.f32 %v4824_v42, %v1619_v2  ;;  %v2498_v58 = vmul.f32 %v2414_v25, %v2274_v1  ;;  %v4832_v47 = vld [vmem:[#allocation30_spill] sm:$0xff]  ;;  %v4833_v34 = vld [vmem:[#allocation31_spill] sm:$0xff] }
 0x1c0   : > { %v1906_v23 = vadd.f32 %v1842_v20, %v4825_v62  ;;  %v1844_v44 = vmul.f32 %v4824_v42, %v1621_v3  ;;  %v2499_v36 = vmul.f32 %v2414_v25, %v2276_v15 }
 0x1c1   : > { %v2560_v18 = vadd.f32 %v2496_v10, %v1905_v37  ;;  %v1907_v27 = vadd.f32 %v1843_v16, %v4826_v26 }
 0x1c2   : > { %v2561_v63 = vadd.f32 %v2497_v48, %v1906_v23  ;;  %v1908_v19 = vadd.f32 %v1844_v44, %v4827_v60  ;;  %v1624_v14 = vpop.f32.mrb[76].mxu1  ;;  %v2279_v6 = vpop.f32.mrb[76].mxu0 }
 0x1c3   : > { %2624 = vst [vmem:[%s4288_s26 + $0x140] sm:$0xff] %v2560_v18  ;;  %v2562_v7 = vadd.f32 %v2498_v58, %v1907_v27  ;;  %v1625_v17 = vadd.f32 %v1624_v14, %v4234_v45  ;;  %v2280_v12 = vadd.f32 %v2279_v6, %v4249_v41  ;;  %v1626_v43 = vpop.f32.mrb[77].mxu1  ;;  %v2281_v33 = vpop.f32.mrb[77].mxu0  ;;  %v4834_v18 = vld [vmem:[#allocation53_spill] sm:$0xff] }
 0x1c4   : > { %2625 = vst [vmem:[%s4288_s26 + $0x148] sm:$0xff] %v2561_v63  ;;  %v2563_v50 = vadd.f32 %v2499_v36, %v1908_v19  ;;  %v1627_v29 = vadd.f32 %v1626_v43, %v4256_v55  ;;  %v2282_v52 = vadd.f32 %v2281_v33, %v4259_v8  ;;  %v1628_v24 = vpop.f32.mrb[78].mxu1  ;;  %v2283_v32 = vpop.f32.mrb[78].mxu0  ;;  %v4836_v43 = vld [vmem:[#allocation63_spill] sm:$0xff] }
 0x1c5   : > { %2626 = vst [vmem:[%s4288_s26 + $0x150] sm:$0xff] %v2562_v7  ;;  %v1845_v61 = vmul.f32 %v4828_v49, %v1625_v17  ;;  %v1629_v5 = vadd.f32 %v1628_v24, %v4234_v45  ;;  %v2284_v13 = vadd.f32 %v2283_v32, %v4249_v41  ;;  %v1630_v57 = vpop.f32.mrb[79].mxu1  ;;  %v2285_v28 = vpop.f32.mrb[79].mxu0  ;;  %v2500_v11 = vmul.f32 %v2418_v40, %v2280_v12  ;;  %v4835_v7 = vld [vmem:[#allocation34_spill] sm:$0xff] }
 0x1c6   : > { %2627 = vst [vmem:[%s4288_s26 + $0x158] sm:$0xff] %v2563_v50  ;;  %v1846_v9 = vmul.f32 %v4828_v49, %v1627_v29  ;;  %v1631_v54 = vadd.f32 %v1630_v57, %v4256_v55  ;;  %v2286_v46 = vadd.f32 %v2285_v28, %v4259_v8  ;;  %v2422_v4 = vpop.permute.xlu1 %2421  ;;  %v2501_v35 = vmul.f32 %v2418_v40, %v2282_v52  ;;  %v2426_v19 = vpop.permute.xlu0 %2425  ;;  %v4837_v29 = vld [vmem:[#allocation35_spill] sm:$0xff] }
 0x1c7   : > { %v1909_v51 = vadd.f32 %v1845_v61, %v4829_v56  ;;  %v1847_v21 = vmul.f32 %v4830_v30, %v1629_v5  ;;  %v2502_v1 = vmul.f32 %v2422_v4, %v2284_v13  ;;  %v4838_v61 = vld [vmem:[#allocation38_spill] sm:$0xff]  ;;  %v4839_v28 = vld [vmem:[#allocation39_spill] sm:$0xff] }
 0x1c8   : > { %v1910_v59 = vadd.f32 %v1846_v9, %v4831_v39  ;;  %v1848_v22 = vmul.f32 %v4830_v30, %v1631_v54  ;;  %v2503_v20 = vmul.f32 %v2422_v4, %v2286_v46 }
 0x1c9   : > { %v2564_v0 = vadd.f32 %v2500_v11, %v1909_v51  ;;  %v1911_v2 = vadd.f32 %v1847_v21, %v4832_v47 }
 0x1ca   : > { %v2565_v31 = vadd.f32 %v2501_v35, %v1910_v59  ;;  %v1912_v53 = vadd.f32 %v1848_v22, %v4833_v34  ;;  %v1634_v3 = vpop.f32.mrb[80].mxu1  ;;  %v2289_v15 = vpop.f32.mrb[80].mxu0 }
 0x1cb   : > { %2628 = vst [vmem:[%s4288_s26 + $0x160] sm:$0xff] %v2564_v0  ;;  %v2566_v38 = vadd.f32 %v2502_v1, %v1911_v2  ;;  %v1635_v37 = vadd.f32 %v1634_v3, %v4234_v45  ;;  %v2290_v10 = vadd.f32 %v2289_v15, %v4249_v41  ;;  %v1636_v42 = vpop.f32.mrb[81].mxu1  ;;  %v2291_v16 = vpop.f32.mrb[81].mxu0  ;;  %v4840_v0 = vld [vmem:[#allocation62_spill] sm:$0xff] }
 0x1cc   : > { %2629 = vst [vmem:[%s4288_s26 + $0x168] sm:$0xff] %v2565_v31  ;;  %v2567_v25 = vadd.f32 %v2503_v20, %v1912_v53  ;;  %v1637_v62 = vadd.f32 %v1636_v42, %v4256_v55  ;;  %v2292_v23 = vadd.f32 %v2291_v16, %v4259_v8  ;;  %v1638_v48 = vpop.f32.mrb[82].mxu1  ;;  %v2293_v44 = vpop.f32.mrb[82].mxu0  ;;  %v4842_v42 = vld [vmem:[#allocation66_spill] sm:$0xff] }
 0x1cd   : > { %2630 = vst [vmem:[%s4288_s26 + $0x170] sm:$0xff] %v2566_v38  ;;  %v1849_v26 = vmul.f32 %v4834_v18, %v1635_v37  ;;  %v1639_v27 = vadd.f32 %v1638_v48, %v4234_v45  ;;  %v2294_v58 = vadd.f32 %v2293_v44, %v4249_v41  ;;  %v1640_v63 = vpop.f32.mrb[83].mxu1  ;;  %v2295_v60 = vpop.f32.mrb[83].mxu0  ;;  %v2504_v12 = vmul.f32 %v2426_v19, %v2290_v10  ;;  %v4841_v38 = vld [vmem:[#allocation44_spill] sm:$0xff] }
 0x1ce   : > { %2631 = vst [vmem:[%s4288_s26 + $0x178] sm:$0xff] %v2567_v25  ;;  %v1850_v36 = vmul.f32 %v4834_v18, %v1637_v62  ;;  %v1641_v14 = vadd.f32 %v1640_v63, %v4256_v55  ;;  %v2296_v6 = vadd.f32 %v2295_v60, %v4259_v8  ;;  %v2430_v50 = vpop.permute.xlu1 %2429  ;;  %v2505_v24 = vmul.f32 %v2426_v19, %v2292_v23  ;;  %v2434_v53 = vpop.permute.xlu0 %2433  ;;  %v4843_v62 = vld [vmem:[#allocation47_spill] sm:$0xff] }
 0x1cf   : > { %v1913_v17 = vadd.f32 %v1849_v26, %v4835_v7  ;;  %v1851_v33 = vmul.f32 %v4836_v43, %v1639_v27  ;;  %v2506_v13 = vmul.f32 %v2430_v50, %v2294_v58  ;;  %v4844_v26 = vld [vmem:[#allocation50_spill] sm:$0xff]  ;;  %v4845_v60 = vld [vmem:[#allocation51_spill] sm:$0xff] }
 0x1d0   : > { %v1914_v52 = vadd.f32 %v1850_v36, %v4837_v29  ;;  %v1852_v32 = vmul.f32 %v4836_v43, %v1641_v14  ;;  %v2507_v9 = vmul.f32 %v2430_v50, %v2296_v6 }
 0x1d1   : > { %v2568_v49 = vadd.f32 %v2504_v12, %v1913_v17  ;;  %v1915_v5 = vadd.f32 %v1851_v33, %v4838_v61 }
 0x1d2   : > { %v2569_v57 = vadd.f32 %v2505_v24, %v1914_v52  ;;  %v1916_v40 = vadd.f32 %v1852_v32, %v4839_v28  ;;  %v1644_v54 = vpop.f32.mrb[84].mxu1  ;;  %v2299_v46 = vpop.f32.mrb[84].mxu0 }
 0x1d3   : > { %2632 = vst [vmem:[%s4288_s26 + $0x180] sm:$0xff] %v2568_v49  ;;  %v2570_v56 = vadd.f32 %v2506_v13, %v1915_v5  ;;  %v1645_v51 = vadd.f32 %v1644_v54, %v4234_v45  ;;  %v2300_v11 = vadd.f32 %v2299_v46, %v4249_v41  ;;  %v1646_v30 = vpop.f32.mrb[85].mxu1  ;;  %v2301_v21 = vpop.f32.mrb[85].mxu0  ;;  %v4846_v49 = vld [vmem:[#allocation65_spill] sm:$0xff] }
 0x1d4   : > { %2633 = vst [vmem:[%s4288_s26 + $0x188] sm:$0xff] %v2569_v57  ;;  %v2571_v4 = vadd.f32 %v2507_v9, %v1916_v40  ;;  %v1647_v39 = vadd.f32 %v1646_v30, %v4256_v55  ;;  %v2302_v59 = vadd.f32 %v2301_v21, %v4259_v8  ;;  %v1648_v35 = vpop.f32.mrb[86].mxu1  ;;  %v2303_v22 = vpop.f32.mrb[86].mxu0  ;;  %v4849_v30 = vld [vmem:[#allocation56_spill] sm:$0xff] }
 0x1d5   : > { %2634 = vst [vmem:[%s4288_s26 + $0x190] sm:$0xff] %v2570_v56  ;;  %v1853_v47 = vmul.f32 %v4840_v0, %v1645_v51  ;;  %v1649_v2 = vadd.f32 %v1648_v35, %v4234_v45  ;;  %v2304_v1 = vadd.f32 %v2303_v22, %v4249_v41  ;;  %v1650_v31 = vpop.f32.mrb[87].mxu1  ;;  %v2305_v34 = vpop.f32.mrb[87].mxu0  ;;  %v2508_v10 = vmul.f32 %v2434_v53, %v2300_v11  ;;  %v4847_v56 = vld [vmem:[#allocation58_spill] sm:$0xff]  ;;  %v4851_v35 = vld [vmem:[#allocation61_spill] sm:$0xff] }
 0x1d6   : > { %2635 = vst [vmem:[%s4288_s26 + $0x198] sm:$0xff] %v2571_v4  ;;  %v1854_v20 = vmul.f32 %v4840_v0, %v1647_v39  ;;  %v1651_v3 = vadd.f32 %v1650_v31, %v4256_v55  ;;  %v2306_v15 = vadd.f32 %v2305_v34, %v4259_v8  ;;  %v2438_v25 = vpop.permute.xlu1 %2437  ;;  %v2509_v48 = vmul.f32 %v2434_v53, %v2302_v59  ;;  %v2442_v40 = vpop.permute.xlu0 %2441  ;;  %v4848_v51 = vld [vmem:[#allocation2_spill] sm:$0xff]  ;;  %v4850_v39 = vld [vmem:[#allocation75_spill] sm:$0xff] }
 0x1d7   : > { %v1917_v37 = vadd.f32 %v1853_v47, %v4841_v38  ;;  %v1855_v16 = vmul.f32 %v4842_v42, %v1649_v2  ;;  %v2510_v58 = vmul.f32 %v2438_v25, %v2304_v1  ;;  %v1204_v11 = vmul.f32 %v4848_v51, %v4847_v56  ;;  %v4852_v47 = vld [vmem:[#allocation60_spill] sm:$0xff] }
 0x1d8   : > { %v1918_v23 = vadd.f32 %v1854_v20, %v4843_v62  ;;  %v1856_v44 = vmul.f32 %v4842_v42, %v1651_v3  ;;  %v2511_v36 = vmul.f32 %v2438_v25, %v2306_v15  ;;  %v1205_v22 = vmul.f32 %v4848_v51, %v4851_v35 }
 0x1d9   : > { %v2572_v18 = vadd.f32 %v2508_v10, %v1917_v37  ;;  %v1919_v27 = vadd.f32 %v1855_v16, %v4844_v26 }
 0x1da   : > { %v2573_v63 = vadd.f32 %v2509_v48, %v1918_v23  ;;  %v1920_v19 = vadd.f32 %v1856_v44, %v4845_v60  ;;  %v1654_v14 = vpop.f32.mrb[88].mxu1  ;;  %v2309_v6 = vpop.f32.mrb[88].mxu0 }
 0x1db   : > { %2636 = vst [vmem:[%s4288_s26 + $0x1a0] sm:$0xff] %v2572_v18  ;;  %v2574_v7 = vadd.f32 %v2510_v58, %v1919_v27  ;;  %v1655_v17 = vadd.f32 %v1654_v14, %v4234_v45  ;;  %v2310_v12 = vadd.f32 %v2309_v6, %v4249_v41  ;;  %v1656_v43 = vpop.f32.mrb[89].mxu1  ;;  %v2311_v33 = vpop.f32.mrb[89].mxu0  ;;  %v4853_v58 = vld [vmem:[#allocation74_spill] sm:$0xff] }
 0x1dc   : > { %2637 = vst [vmem:[%s4288_s26 + $0x1a8] sm:$0xff] %v2573_v63  ;;  %v2575_v50 = vadd.f32 %v2511_v36, %v1920_v19  ;;  %v1657_v29 = vadd.f32 %v1656_v43, %v4256_v55  ;;  %v2312_v52 = vadd.f32 %v2311_v33, %v4259_v8  ;;  %v1658_v24 = vpop.f32.mrb[90].mxu1  ;;  %v2313_v32 = vpop.f32.mrb[90].mxu0  ;;  %v4854_v43 = vld [vmem:[#allocation70_spill] sm:$0xff]  ;;  %v4855_v33 = vld [vmem:[#allocation3_spill] sm:$0xff] }
 0x1dd   : > { %2638 = vst [vmem:[%s4288_s26 + $0x1b0] sm:$0xff] %v2574_v7  ;;  %v1857_v61 = vmul.f32 %v4846_v49, %v1655_v17  ;;  %v1659_v5 = vadd.f32 %v1658_v24, %v4234_v45  ;;  %v2314_v13 = vadd.f32 %v2313_v32, %v4249_v41  ;;  %v1660_v57 = vpop.f32.mrb[91].mxu1  ;;  %v2315_v28 = vpop.f32.mrb[91].mxu0  ;;  %v2512_v4 = vmul.f32 %v2442_v40, %v2310_v12  ;;  %v4857_v24 = vld [vmem:[#allocation76_spill] sm:$0xff]  ;;  %v4858_v32 = vld [vmem:[#allocation73_spill] sm:$0xff] }
 0x1de   : > { %2639 = vst [vmem:[%s4288_s26 + $0x1b8] sm:$0xff] %v2575_v50  ;;  %v1858_v9 = vmul.f32 %v4846_v49, %v1657_v29  ;;  %v1661_v54 = vadd.f32 %v1660_v57, %v4256_v55  ;;  %v2316_v46 = vadd.f32 %v2315_v28, %v4259_v8  ;;  %v2446_v0 = vpop.permute.xlu1 %2445  ;;  %v2513_v1 = vmul.f32 %v2442_v40, %v2312_v52  ;;  %v2450_v6 = vpop.permute.xlu0 %2449  ;;  %v4856_v29 = vld [vmem:[#allocation68_spill] sm:$0xff] }
 0x1df   : > { %v1921_v21 = vadd.f32 %v1857_v61, %v4849_v30  ;;  %v1859_v59 = vmul.f32 %v4850_v39, %v1659_v5  ;;  %v2514_v20 = vmul.f32 %v2446_v0, %v2314_v13  ;;  %v1208_v50 = vmul.f32 %v4855_v33, %v4854_v43  ;;  %v4859_v5 = vld [vmem:[#allocation72_spill] sm:$0xff] }
 0x1e0   : > { %v1922_v2 = vadd.f32 %v1858_v9, %v4852_v47  ;;  %v1860_v31 = vmul.f32 %v4850_v39, %v1661_v54  ;;  %v2515_v38 = vmul.f32 %v2446_v0, %v2316_v46  ;;  %v1209_v49 = vmul.f32 %v4855_v33, %v4858_v32 }
 0x1e1   : > { %v2576_v34 = vadd.f32 %v2512_v4, %v1921_v21  ;;  %v1923_v53 = vadd.f32 %v1859_v59, %v1204_v11 }
 0x1e2   : > { %v2577_v3 = vadd.f32 %v2513_v1, %v1922_v2  ;;  %v1924_v15 = vadd.f32 %v1860_v31, %v1205_v22  ;;  %v1664_v37 = vpop.f32.mrb[92].mxu1  ;;  %v2319_v10 = vpop.f32.mrb[92].mxu0 }
 0x1e3   : > { %2640 = vst [vmem:[%s4288_s26 + $0x1c0] sm:$0xff] %v2576_v34  ;;  %v2578_v42 = vadd.f32 %v2514_v20, %v1923_v53  ;;  %v1665_v16 = vadd.f32 %v1664_v37, %v4234_v45  ;;  %v2320_v25 = vadd.f32 %v2319_v10, %v4249_v41  ;;  %v1666_v62 = vpop.f32.mrb[93].mxu1  ;;  %v2321_v23 = vpop.f32.mrb[93].mxu0 }
 0x1e4   : > { %2641 = vst [vmem:[%s4288_s26 + $0x1c8] sm:$0xff] %v2577_v3  ;;  %v2579_v48 = vadd.f32 %v2515_v38, %v1924_v15  ;;  %v1667_v44 = vadd.f32 %v1666_v62, %v4256_v55  ;;  %v2322_v18 = vadd.f32 %v2321_v23, %v4259_v8  ;;  %v1668_v26 = vpop.f32.mrb[94].mxu1  ;;  %v2323_v27 = vpop.f32.mrb[94].mxu0 }
 0x1e5   : > { %2642 = vst [vmem:[%s4288_s26 + $0x1d0] sm:$0xff] %v2578_v42  ;;  %v1861_v63 = vmul.f32 %v4853_v58, %v1665_v16  ;;  %v1669_v60 = vadd.f32 %v1668_v26, %v4234_v45  ;;  %v2324_v19 = vadd.f32 %v2323_v27, %v4249_v41  ;;  %v1670_v36 = vpop.f32.mrb[95].mxu1  ;;  %v2325_v14 = vpop.f32.mrb[95].mxu0  ;;  %v2516_v45 = vmul.f32 %v2450_v6, %v2320_v25 }
 0x1e6   : > { %2643 = vst [vmem:[%s4288_s26 + $0x1d8] sm:$0xff] %v2579_v48  ;;  %v1862_v7 = vmul.f32 %v4853_v58, %v1667_v44  ;;  %v1671_v17 = vadd.f32 %v1670_v36, %v4256_v55  ;;  %v2326_v12 = vadd.f32 %v2325_v14, %v4259_v8  ;;  %v2454_v61 = vpop.permute.xlu1 %2453  ;;  %v2517_v13 = vmul.f32 %v2450_v6, %v2322_v18 }
 0x1e7   : > { %v1925_v52 = vadd.f32 %v1861_v63, %v4856_v29  ;;  %v1863_v41 = vmul.f32 %v4857_v24, %v1669_v60  ;;  %v2518_v40 = vmul.f32 %v2454_v61, %v2324_v19 }
 0x1e8   : > { %v1926_v55 = vadd.f32 %v1862_v7, %v4859_v5  ;;  %v1864_v8 = vmul.f32 %v4857_v24, %v1671_v17  ;;  %v2519_v46 = vmul.f32 %v2454_v61, %v2326_v12 }
 0x1e9   : > { %v2580_v57 = vadd.f32 %v2516_v45, %v1925_v52  ;;  %v1927_v28 = vadd.f32 %v1863_v41, %v1208_v50 }
 0x1ea   : > { %v2581_v9 = vadd.f32 %v2517_v13, %v1926_v55  ;;  %v1928_v54 = vadd.f32 %v1864_v8, %v1209_v49 }
 0x1eb   : > { %2644 = vst [vmem:[%s4288_s26 + $0x1e0] sm:$0xff] %v2580_v57  ;;  %v2582_v56 = vadd.f32 %v2518_v40, %v1927_v28 }
 0x1ec   : > { %2645 = vst [vmem:[%s4288_s26 + $0x1e8] sm:$0xff] %v2581_v9  ;;  %v2583_v51 = vadd.f32 %v2519_v46, %v1928_v54 }
 0x1ed   : > { %2646 = vst [vmem:[%s4288_s26 + $0x1f0] sm:$0xff] %v2582_v56 }
 0x1ee   : > { %2647 = vst [vmem:[%s4288_s26 + $0x1f8] sm:$0xff] %v2583_v51 }
 0x1ef PF: > { %s14_s19 = sadd.s32 1, %s3340_s19   ;;  %s4860_s15 = smov %s3332_s17 }
 0x1f0   : > { %p11_p7 = scmp.ge.s32.totalorder %s14_s19, 8   ;;  %s4861_s16 = smov %s3336_s18 }
 0x1f1   : > { %s4862_s17 = smov %s4865_s20  ;;  %s4863_s18 = smov %s4869_s21 }
 0x1f2   :  { %13 = sbr.rel (!%p11_p7) target bundleno = 3 (0x3), region = 79 }

</bundles_post_ra>
